<compile_context>
chip_gen: v5e
topology: v5e:2x2
jax: 0.10.0
libtpu: 0.0.40
codegen_flags: <defaults>
</compile_context>

<pallas_src>
import functools

import numpy as np
import jax
import jax.numpy as jnp
from jax import lax
from jax.experimental import pallas as pl
from jax.experimental.pallas import tpu as pltpu

START_TAG = "<START>"
STOP_TAG = "<STOP>"

_GATE_ORDER = (0, 1, 3, 2)   # PyTorch LSTM gate chunks [i, f, g, o] -> [i, f, o, g]


# --------------------------------------------------------------------------
# Fused kernel: BiLSTM (1 layer, batch=1) -> Linear -> Viterbi + backtrace
# --------------------------------------------------------------------------
def bilstm_crf_kernel(xcat_ref, wih_ref, b_ref, whh_ref, h0_ref, c0_ref,
                      woutT_ref, wout_ref, boutr_ref, boutc_ref,
                      trans_ref, transT_ref,
                      feats_ref, score_ref, path_ref,
                      *, start_idx, stop_idx):
    S = xcat_ref.shape[0]
    twoH = h0_ref.shape[1]
    H = twoH // 2
    T = trans_ref.shape[0]

    # ---- BiLSTM: fused fwd/bwd directions, input projection hoisted -------
    # xcat row t = [x[t] | x[S-1-t]]; wih is block structured so gates_in[t]
    # holds the interleaved [i|f|o|g] (fwd,bwd) pre-activations for both
    # directions of the fused step t.
    gates_in = (jnp.dot(xcat_ref[...], wih_ref[...],
                        preferred_element_type=jnp.float32) + b_ref[...])    # (S, 8H)

    whh = whh_ref[...]                         # (2H, 8H) block-diagonal recurrent W
    h = h0_ref[...]                            # (1, 2H) = [h_fwd | h_bwd]
    c = c0_ref[...]
    h_steps = []
    for t in range(S):                         # unrolled: state stays in vregs
        g_pre = gates_in[t:t + 1, :] + jnp.dot(
            h, whh, preferred_element_type=jnp.float32)                      # (1, 8H)
        sig = jax.nn.sigmoid(g_pre[:, 0:6 * H])        # i | f | o in one EUP pass
        i_g = sig[:, 0:2 * H]
        f_g = sig[:, 2 * H:4 * H]
        o_g = sig[:, 4 * H:6 * H]
        g_g = jnp.tanh(g_pre[:, 6 * H:8 * H])
        c = f_g * c + i_g * g_g
        h = o_g * jnp.tanh(c)
        h_steps.append(h)

    # fused step t holds [h_fwd(t) | h_bwd(position S-1-t)]; recombine so that
    # lstm_out[t] = [h_fwd(t) | h_bwd(t)]  (PyTorch bidirectional layout).
    h_fwd_order = jnp.concatenate(h_steps, axis=0)          # (S, 2H)
    h_rev_order = jnp.concatenate(h_steps[::-1], axis=0)    # (S, 2H)
    lane2h = lax.broadcasted_iota(jnp.int32, (S, twoH), 1)
    lstm_out = jnp.where(lane2h < H, h_fwd_order, h_rev_order)

    # ---- hidden2tag --------------------------------------------------------
    feats = (jnp.dot(lstm_out, woutT_ref[...],
                     preferred_element_type=jnp.float32) + boutr_ref[...])   # (S, T)
    feats_ref[...] = feats
    # transposed copy (tags on sublanes) for the column-oriented Viterbi steps
    featsT = (lax.dot_general(wout_ref[...], lstm_out,
                              (((1,), (1,)), ((), ())),
                              preferred_element_type=jnp.float32)
              + boutc_ref[...])                                              # (T, S)

    # ---- Viterbi forward recursion (max-plus), alternating orientation ----
    trans = trans_ref[...]
    transT = transT_ref[...]
    lane_row = lax.broadcasted_iota(jnp.int32, (1, T), 1)
    sub_col = lax.broadcasted_iota(jnp.int32, (T, 1), 0)
    col_id = lax.broadcasted_iota(jnp.int32, (T, T), 1)
    row_id = lax.broadcasted_iota(jnp.int32, (T, T), 0)

    fv = jnp.where(lane_row == start_idx,
                   jnp.float32(0.0), jnp.float32(-10000.0))    # (1, T) row
    fv_is_row = True
    bps = []                                   # per-step backpointers, kept in vregs
    for t in range(S):
        if fv_is_row:
            # fv row (prev tag on lanes); M[i, j] = fv[j] + trans[i, j]
            M = fv + trans
            vmax = jnp.max(M, axis=1, keepdims=True)                         # (T, 1)
            bp = jnp.min(jnp.where(M >= vmax, col_id, T),
                         axis=1, keepdims=True)                              # (T, 1)
            fv = vmax + featsT[:, t:t + 1]                                   # -> column
        else:
            # fv column (prev tag on sublanes); M[j, i] = fv[j] + trans[i, j]
            M = fv + transT
            vmax = jnp.max(M, axis=0, keepdims=True)                         # (1, T)
            bp = jnp.min(jnp.where(M >= vmax, row_id, T),
                         axis=0, keepdims=True)                              # (1, T)
            fv = vmax + feats[t:t + 1, :]                                    # -> row
        bps.append((bp, bp.shape[0] == 1))     # (backpointers, is_row)
        fv_is_row = not fv_is_row

    # ---- terminal + first-argmax -------------------------------------------
    if fv_is_row:
        term = fv + trans[stop_idx:stop_idx + 1, :]                          # (1, T)
        tmax = jnp.max(term, axis=1, keepdims=True)                          # (1, 1)
        best = jnp.min(jnp.where(term >= tmax, lane_row, T),
                       axis=1, keepdims=True)                                # (1, 1)
    else:
        term = fv + transT[:, stop_idx:stop_idx + 1]                         # (T, 1)
        tmax = jnp.max(term, axis=0, keepdims=True)
        best = jnp.min(jnp.where(term >= tmax, sub_col, T),
                       axis=0, keepdims=True)
    score_ref[...] = tmax

    # ---- on-device backtrace (one-hot selects, fully unrolled) -------------
    lane_S = lax.broadcasted_iota(jnp.int32, (1, S), 1)
    path_vals = jnp.where(lane_S == (S - 1), best, 0)
    cur = best
    for t in range(S - 1, 0, -1):
        bp, bp_is_row = bps[t]
        if bp_is_row:
            prev = jnp.max(jnp.where(lane_row == cur, bp, 0),
                           axis=1, keepdims=True)                            # (1, 1)
        else:
            prev = jnp.max(jnp.where(sub_col == cur, bp, 0),
                           axis=0, keepdims=True)                            # (1, 1)
        path_vals = jnp.where(lane_S == (t - 1), prev, path_vals)
        cur = prev
    # bps[0][path[0]] == start_idx is the popped START entry (PyTorch assert).
    path_ref[...] = path_vals


# --------------------------------------------------------------------------
# Wrappers
# --------------------------------------------------------------------------
def _vmem_spec():
    return pl.BlockSpec(memory_space=pltpu.MemorySpace.VMEM)


def prep_params(wih_f, whh_f, bih_f, bhh_f, wih_b, whh_b, bih_b, bhh_b,
                wout, bout, h0, c0, transitions):
    """Repack raw PyTorch-layout weights into the fused-kernel layout."""
    fourH, E = wih_f.shape
    H = fourH // 4

    def interleave(wf_T, wb_T, nrows):
        z = jnp.zeros((nrows, H), jnp.float32)
        top, bot = [], []
        for k in _GATE_ORDER:
            top += [wf_T[:, k * H:(k + 1) * H], z]
            bot += [z, wb_T[:, k * H:(k + 1) * H]]
        return jnp.concatenate(top, axis=1), jnp.concatenate(bot, axis=1)

    ih_top, ih_bot = interleave(wih_f.T, wih_b.T, E)
    wih_comb = jnp.concatenate([ih_top, ih_bot], axis=0)            # (2E, 8H)

    hh_top, hh_bot = interleave(whh_f.T, whh_b.T, H)
    whh_bd = jnp.concatenate([hh_top, hh_bot], axis=0)              # (2H, 8H)

    bf = bih_f + bhh_f
    bb = bih_b + bhh_b
    b_comb = jnp.concatenate(
        [jnp.concatenate([bf[k * H:(k + 1) * H], bb[k * H:(k + 1) * H]])
         for k in _GATE_ORDER])[None, :]                             # (1, 8H)

    return {
        "wih_comb": wih_comb, "whh_bd": whh_bd, "b_comb": b_comb,
        "h0_cat": jnp.concatenate([h0[0], h0[1]])[None, :],
        "c0_cat": jnp.concatenate([c0[0], c0[1]])[None, :],
        "wout_T": wout.T, "wout": wout,
        "bout_row": bout[None, :], "bout_col": bout[:, None],
        "trans": transitions, "transT": transitions.T,
    }


@functools.partial(jax.jit, static_argnums=(2, 3))
def bilstm_crf_forward(sentence, prep, start_idx, stop_idx):
    """Mirrors BiLSTM_CRF.forward: returns (path_score, best_path, lstm_feats)."""
    S, _, E = sentence.shape
    x2d = sentence.reshape(S, E).astype(jnp.float32)
    x_cat = jnp.concatenate([x2d, x2d[::-1]], axis=1)                # (S, 2E)
    T = prep["trans"].shape[0]

    kern = functools.partial(bilstm_crf_kernel,
                             start_idx=start_idx, stop_idx=stop_idx)
    feats, score, path = pl.pallas_call(
        kern,
        out_shape=(jax.ShapeDtypeStruct((S, T), jnp.float32),
                   jax.ShapeDtypeStruct((1, 1), jnp.float32),
                   jax.ShapeDtypeStruct((1, S), jnp.int32)),
        in_specs=[_vmem_spec()] * 12,
        out_specs=(_vmem_spec(), _vmem_spec(), _vmem_spec()),
    )(x_cat, prep["wih_comb"], prep["b_comb"], prep["whh_bd"],
      prep["h0_cat"], prep["c0_cat"], prep["wout_T"], prep["wout"],
      prep["bout_row"], prep["bout_col"], prep["trans"], prep["transT"])
    return score, path, feats


# --------------------------------------------------------------------------
# Pure-numpy reference (for correctness check)
# --------------------------------------------------------------------------
def _sigmoid(z):
    return 1.0 / (1.0 + np.exp(-z))


def ref_forward(sentence, P, start_idx, stop_idx):
    S = sentence.shape[0]
    x = sentence.reshape(S, -1).astype(np.float64)
    H = P["whh_f"].shape[1]

    def run_dir(w_ih, w_hh, b_ih, b_hh, h0, c0, reverse):
        h = h0.astype(np.float64).copy()
        c = c0.astype(np.float64).copy()
        out = np.zeros((S, H), np.float64)
        order = range(S - 1, -1, -1) if reverse else range(S)
        for t in order:
            g = x[t] @ w_ih.T + h @ w_hh.T + b_ih + b_hh
            i = _sigmoid(g[0:H])
            f = _sigmoid(g[H:2 * H])
            gg = np.tanh(g[2 * H:3 * H])
            o = _sigmoid(g[3 * H:4 * H])
            c = f * c + i * gg
            h = o * np.tanh(c)
            out[t] = h
        return out

    hf = run_dir(P["wih_f"], P["whh_f"], P["bih_f"], P["bhh_f"],
                 P["h0"][0], P["c0"][0], False)
    hb = run_dir(P["wih_b"], P["whh_b"], P["bih_b"], P["bhh_b"],
                 P["h0"][1], P["c0"][1], True)
    lstm_out = np.concatenate([hf, hb], axis=1)
    feats = lstm_out @ P["wout"].T + P["bout"]

    trans = P["transitions"].astype(np.float64)
    T = trans.shape[0]
    fv = np.full((T,), -10000.0)
    fv[start_idx] = 0.0
    bptrs = []
    for t in range(S):
        ntv = fv[None, :] + trans
        bp = np.argmax(ntv, axis=1)
        vv = ntv[np.arange(T), bp]
        fv = vv + feats[t]
        bptrs.append(bp)
    term = fv + trans[stop_idx]
    best = int(np.argmax(term))
    score = float(term[best])
    path = [best]
    for bp in reversed(bptrs):
        best = int(bp[best])
        path.append(best)
    path.pop()
    path.reverse()
    return feats.astype(np.float32), score, path


# --------------------------------------------------------------------------
# Main
# --------------------------------------------------------------------------
if __name__ == "__main__":
    tag_to_ix = {"B": 0, "I": 1, "O": 2, START_TAG: 3, STOP_TAG: 4}
    vocab_size = 10          # unused in forward (sentence is already embedded)
    embedding_dim = 8
    hidden_dim = 32
    seq_len = 8

    T = len(tag_to_ix)
    H = hidden_dim // 2
    START_IDX = tag_to_ix[START_TAG]
    STOP_IDX = tag_to_ix[STOP_TAG]

    key = jax.random.PRNGKey(0)
    ks = jax.random.split(key, 16)
    sc = 0.2

    wih_f = sc * jax.random.normal(ks[0], (4 * H, embedding_dim), jnp.float32)
    whh_f = sc * jax.random.normal(ks[1], (4 * H, H), jnp.float32)
    bih_f = sc * jax.random.normal(ks[2], (4 * H,), jnp.float32)
    bhh_f = sc * jax.random.normal(ks[3], (4 * H,), jnp.float32)
    wih_b = sc * jax.random.normal(ks[4], (4 * H, embedding_dim), jnp.float32)
    whh_b = sc * jax.random.normal(ks[5], (4 * H, H), jnp.float32)
    bih_b = sc * jax.random.normal(ks[6], (4 * H,), jnp.float32)
    bhh_b = sc * jax.random.normal(ks[7], (4 * H,), jnp.float32)
    wout = sc * jax.random.normal(ks[8], (T, hidden_dim), jnp.float32)
    bout = sc * jax.random.normal(ks[9], (T,), jnp.float32)
    h0 = sc * jax.random.normal(ks[10], (2, H), jnp.float32)   # (directions, H)
    c0 = sc * jax.random.normal(ks[11], (2, H), jnp.float32)
    transitions = jax.random.normal(ks[12], (T, T), jnp.float32)
    transitions = transitions.at[START_IDX, :].set(-10000.0)
    transitions = transitions.at[:, STOP_IDX].set(-10000.0)

    sentence = jax.random.normal(ks[13], (seq_len, 1, embedding_dim), jnp.float32)

    prep = prep_params(wih_f, whh_f, bih_f, bhh_f, wih_b, whh_b, bih_b, bhh_b,
                       wout, bout, h0, c0, transitions)

    score, path, feats = bilstm_crf_forward(sentence, prep, START_IDX, STOP_IDX)
    jax.block_until_ready((score, path, feats))

    path_score = float(np.asarray(score)[0, 0])
    best_path = [int(v) for v in np.asarray(path)[0]]

    # Numpy reference check.
    P_np = {
        "wih_f": np.asarray(wih_f), "whh_f": np.asarray(whh_f),
        "bih_f": np.asarray(bih_f), "bhh_f": np.asarray(bhh_f),
        "wih_b": np.asarray(wih_b), "whh_b": np.asarray(whh_b),
        "bih_b": np.asarray(bih_b), "bhh_b": np.asarray(bhh_b),
        "wout": np.asarray(wout), "bout": np.asarray(bout),
        "h0": np.asarray(h0), "c0": np.asarray(c0),
        "transitions": np.asarray(transitions),
    }
    feats_ref, score_ref, path_ref = ref_forward(
        np.asarray(sentence), P_np, START_IDX, STOP_IDX)

    np.testing.assert_allclose(np.asarray(feats), feats_ref, rtol=2e-3, atol=2e-3)
    assert abs(path_score - score_ref) < 1e-2, (path_score, score_ref)
    assert best_path == path_ref, (best_path, path_ref)

    print("KERNEL_OK")
</pallas_src>

<mosaic_0001>
module attributes {stable_mosaic.version = 11 : i64} {
  func.func @bilstm_crf_kernel(%arg0: memref<8x16xf32, #tpu.memory_space<vmem>>, %arg1: memref<16x128xf32, #tpu.memory_space<vmem>>, %arg2: memref<1x128xf32, #tpu.memory_space<vmem>>, %arg3: memref<32x128xf32, #tpu.memory_space<vmem>>, %arg4: memref<1x32xf32, #tpu.memory_space<vmem>>, %arg5: memref<1x32xf32, #tpu.memory_space<vmem>>, %arg6: memref<32x5xf32, #tpu.memory_space<vmem>>, %arg7: memref<5x32xf32, #tpu.memory_space<vmem>>, %arg8: memref<1x5xf32, #tpu.memory_space<vmem>>, %arg9: memref<5x1xf32, #tpu.memory_space<vmem>>, %arg10: memref<5x5xf32, #tpu.memory_space<vmem>>, %arg11: memref<5x5xf32, #tpu.memory_space<vmem>>, %arg12: memref<8x5xf32, #tpu.memory_space<vmem>>, %arg13: memref<1x1xf32, #tpu.memory_space<vmem>>, %arg14: memref<1x8xi32, #tpu.memory_space<vmem>>) attributes {dimension_semantics = [], scalar_prefetch = 0 : i64, scratch_operands = 0 : i64, tpu.core_type = #tpu.core_type<tc>} {
    %c0 = arith.constant 0 : index
    %c0_0 = arith.constant 0 : index
    %0 = vector.load %arg0[%c0, %c0_0] : memref<8x16xf32, #tpu.memory_space<vmem>>, vector<8x16xf32>
    %c0_1 = arith.constant 0 : index
    %c0_2 = arith.constant 0 : index
    %1 = vector.load %arg1[%c0_1, %c0_2] : memref<16x128xf32, #tpu.memory_space<vmem>>, vector<16x128xf32>
    %cst = arith.constant dense<0.000000e+00> : vector<8x128xf32>
    %2 = tpu.matmul %0, %1, %cst {dimension_numbers = #tpu.dot_dimension_numbers<[1], [0], [0], [1], [0, 0, 1, 1], [], []>} : vector<8x16xf32>, vector<16x128xf32>, vector<8x128xf32> -> vector<8x128xf32>
    %c0_3 = arith.constant 0 : index
    %c0_4 = arith.constant 0 : index
    %3 = vector.load %arg2[%c0_3, %c0_4] : memref<1x128xf32, #tpu.memory_space<vmem>>, vector<1x128xf32>
    %4 = vector.broadcast %3 : vector<1x128xf32> to vector<8x128xf32>
    %5 = arith.addf %2, %4 : vector<8x128xf32>
    %c0_5 = arith.constant 0 : index
    %c0_6 = arith.constant 0 : index
    %6 = vector.load %arg3[%c0_5, %c0_6] : memref<32x128xf32, #tpu.memory_space<vmem>>, vector<32x128xf32>
    %c0_7 = arith.constant 0 : index
    %c0_8 = arith.constant 0 : index
    %7 = vector.load %arg4[%c0_7, %c0_8] : memref<1x32xf32, #tpu.memory_space<vmem>>, vector<1x32xf32>
    %c0_9 = arith.constant 0 : index
    %c0_10 = arith.constant 0 : index
    %8 = vector.load %arg5[%c0_9, %c0_10] : memref<1x32xf32, #tpu.memory_space<vmem>>, vector<1x32xf32>
    %9 = vector.extract_strided_slice %5 {offsets = [0, 0], sizes = [1, 128], strides = [1, 1]} : vector<8x128xf32> to vector<1x128xf32>
    %cst_11 = arith.constant dense<0.000000e+00> : vector<1x128xf32>
    %10 = tpu.matmul %7, %6, %cst_11 {dimension_numbers = #tpu.dot_dimension_numbers<[1], [0], [0], [1], [0, 0, 1, 1], [], []>} : vector<1x32xf32>, vector<32x128xf32>, vector<1x128xf32> -> vector<1x128xf32>
    %11 = arith.addf %9, %10 : vector<1x128xf32>
    %12 = vector.extract_strided_slice %11 {offsets = [0, 0], sizes = [1, 96], strides = [1, 1]} : vector<1x128xf32> to vector<1x96xf32>
    %13 = arith.negf %12 : vector<1x96xf32>
    %14 = math.exp %13 : vector<1x96xf32>
    %cst_12 = arith.constant 1.000000e+00 : f32
    %15 = vector.broadcast %cst_12 : f32 to vector<1x96xf32>
    %16 = arith.addf %15, %14 : vector<1x96xf32>
    %17 = arith.divf %15, %16 : vector<1x96xf32>
    %18 = vector.extract_strided_slice %17 {offsets = [0, 0], sizes = [1, 32], strides = [1, 1]} : vector<1x96xf32> to vector<1x32xf32>
    %19 = vector.extract_strided_slice %17 {offsets = [0, 32], sizes = [1, 32], strides = [1, 1]} : vector<1x96xf32> to vector<1x32xf32>
    %20 = vector.extract_strided_slice %17 {offsets = [0, 64], sizes = [1, 32], strides = [1, 1]} : vector<1x96xf32> to vector<1x32xf32>
    %21 = vector.extract_strided_slice %11 {offsets = [0, 96], sizes = [1, 32], strides = [1, 1]} : vector<1x128xf32> to vector<1x32xf32>
    %22 = math.tanh %21 : vector<1x32xf32>
    %23 = arith.mulf %19, %8 : vector<1x32xf32>
    %24 = arith.mulf %18, %22 : vector<1x32xf32>
    %25 = arith.addf %23, %24 : vector<1x32xf32>
    %26 = math.tanh %25 : vector<1x32xf32>
    %27 = arith.mulf %20, %26 : vector<1x32xf32>
    %28 = vector.extract_strided_slice %5 {offsets = [1, 0], sizes = [1, 128], strides = [1, 1]} : vector<8x128xf32> to vector<1x128xf32>
    %cst_13 = arith.constant dense<0.000000e+00> : vector<1x128xf32>
    %29 = tpu.matmul %27, %6, %cst_13 {dimension_numbers = #tpu.dot_dimension_numbers<[1], [0], [0], [1], [0, 0, 1, 1], [], []>} : vector<1x32xf32>, vector<32x128xf32>, vector<1x128xf32> -> vector<1x128xf32>
    %30 = arith.addf %28, %29 : vector<1x128xf32>
    %31 = vector.extract_strided_slice %30 {offsets = [0, 0], sizes = [1, 96], strides = [1, 1]} : vector<1x128xf32> to vector<1x96xf32>
    %32 = arith.negf %31 : vector<1x96xf32>
    %33 = math.exp %32 : vector<1x96xf32>
    %cst_14 = arith.constant 1.000000e+00 : f32
    %34 = vector.broadcast %cst_14 : f32 to vector<1x96xf32>
    %35 = arith.addf %34, %33 : vector<1x96xf32>
    %36 = arith.divf %34, %35 : vector<1x96xf32>
    %37 = vector.extract_strided_slice %36 {offsets = [0, 0], sizes = [1, 32], strides = [1, 1]} : vector<1x96xf32> to vector<1x32xf32>
    %38 = vector.extract_strided_slice %36 {offsets = [0, 32], sizes = [1, 32], strides = [1, 1]} : vector<1x96xf32> to vector<1x32xf32>
    %39 = vector.extract_strided_slice %36 {offsets = [0, 64], sizes = [1, 32], strides = [1, 1]} : vector<1x96xf32> to vector<1x32xf32>
    %40 = vector.extract_strided_slice %30 {offsets = [0, 96], sizes = [1, 32], strides = [1, 1]} : vector<1x128xf32> to vector<1x32xf32>
    %41 = math.tanh %40 : vector<1x32xf32>
    %42 = arith.mulf %38, %25 : vector<1x32xf32>
    %43 = arith.mulf %37, %41 : vector<1x32xf32>
    %44 = arith.addf %42, %43 : vector<1x32xf32>
    %45 = math.tanh %44 : vector<1x32xf32>
    %46 = arith.mulf %39, %45 : vector<1x32xf32>
    %47 = vector.extract_strided_slice %5 {offsets = [2, 0], sizes = [1, 128], strides = [1, 1]} : vector<8x128xf32> to vector<1x128xf32>
    %cst_15 = arith.constant dense<0.000000e+00> : vector<1x128xf32>
    %48 = tpu.matmul %46, %6, %cst_15 {dimension_numbers = #tpu.dot_dimension_numbers<[1], [0], [0], [1], [0, 0, 1, 1], [], []>} : vector<1x32xf32>, vector<32x128xf32>, vector<1x128xf32> -> vector<1x128xf32>
    %49 = arith.addf %47, %48 : vector<1x128xf32>
    %50 = vector.extract_strided_slice %49 {offsets = [0, 0], sizes = [1, 96], strides = [1, 1]} : vector<1x128xf32> to vector<1x96xf32>
    %51 = arith.negf %50 : vector<1x96xf32>
    %52 = math.exp %51 : vector<1x96xf32>
    %cst_16 = arith.constant 1.000000e+00 : f32
    %53 = vector.broadcast %cst_16 : f32 to vector<1x96xf32>
    %54 = arith.addf %53, %52 : vector<1x96xf32>
    %55 = arith.divf %53, %54 : vector<1x96xf32>
    %56 = vector.extract_strided_slice %55 {offsets = [0, 0], sizes = [1, 32], strides = [1, 1]} : vector<1x96xf32> to vector<1x32xf32>
    %57 = vector.extract_strided_slice %55 {offsets = [0, 32], sizes = [1, 32], strides = [1, 1]} : vector<1x96xf32> to vector<1x32xf32>
    %58 = vector.extract_strided_slice %55 {offsets = [0, 64], sizes = [1, 32], strides = [1, 1]} : vector<1x96xf32> to vector<1x32xf32>
    %59 = vector.extract_strided_slice %49 {offsets = [0, 96], sizes = [1, 32], strides = [1, 1]} : vector<1x128xf32> to vector<1x32xf32>
    %60 = math.tanh %59 : vector<1x32xf32>
    %61 = arith.mulf %57, %44 : vector<1x32xf32>
    %62 = arith.mulf %56, %60 : vector<1x32xf32>
    %63 = arith.addf %61, %62 : vector<1x32xf32>
    %64 = math.tanh %63 : vector<1x32xf32>
    %65 = arith.mulf %58, %64 : vector<1x32xf32>
    %66 = vector.extract_strided_slice %5 {offsets = [3, 0], sizes = [1, 128], strides = [1, 1]} : vector<8x128xf32> to vector<1x128xf32>
    %cst_17 = arith.constant dense<0.000000e+00> : vector<1x128xf32>
    %67 = tpu.matmul %65, %6, %cst_17 {dimension_numbers = #tpu.dot_dimension_numbers<[1], [0], [0], [1], [0, 0, 1, 1], [], []>} : vector<1x32xf32>, vector<32x128xf32>, vector<1x128xf32> -> vector<1x128xf32>
    %68 = arith.addf %66, %67 : vector<1x128xf32>
    %69 = vector.extract_strided_slice %68 {offsets = [0, 0], sizes = [1, 96], strides = [1, 1]} : vector<1x128xf32> to vector<1x96xf32>
    %70 = arith.negf %69 : vector<1x96xf32>
    %71 = math.exp %70 : vector<1x96xf32>
    %cst_18 = arith.constant 1.000000e+00 : f32
    %72 = vector.broadcast %cst_18 : f32 to vector<1x96xf32>
    %73 = arith.addf %72, %71 : vector<1x96xf32>
    %74 = arith.divf %72, %73 : vector<1x96xf32>
    %75 = vector.extract_strided_slice %74 {offsets = [0, 0], sizes = [1, 32], strides = [1, 1]} : vector<1x96xf32> to vector<1x32xf32>
    %76 = vector.extract_strided_slice %74 {offsets = [0, 32], sizes = [1, 32], strides = [1, 1]} : vector<1x96xf32> to vector<1x32xf32>
    %77 = vector.extract_strided_slice %74 {offsets = [0, 64], sizes = [1, 32], strides = [1, 1]} : vector<1x96xf32> to vector<1x32xf32>
    %78 = vector.extract_strided_slice %68 {offsets = [0, 96], sizes = [1, 32], strides = [1, 1]} : vector<1x128xf32> to vector<1x32xf32>
    %79 = math.tanh %78 : vector<1x32xf32>
    %80 = arith.mulf %76, %63 : vector<1x32xf32>
    %81 = arith.mulf %75, %79 : vector<1x32xf32>
    %82 = arith.addf %80, %81 : vector<1x32xf32>
    %83 = math.tanh %82 : vector<1x32xf32>
    %84 = arith.mulf %77, %83 : vector<1x32xf32>
    %85 = vector.extract_strided_slice %5 {offsets = [4, 0], sizes = [1, 128], strides = [1, 1]} : vector<8x128xf32> to vector<1x128xf32>
    %cst_19 = arith.constant dense<0.000000e+00> : vector<1x128xf32>
    %86 = tpu.matmul %84, %6, %cst_19 {dimension_numbers = #tpu.dot_dimension_numbers<[1], [0], [0], [1], [0, 0, 1, 1], [], []>} : vector<1x32xf32>, vector<32x128xf32>, vector<1x128xf32> -> vector<1x128xf32>
    %87 = arith.addf %85, %86 : vector<1x128xf32>
    %88 = vector.extract_strided_slice %87 {offsets = [0, 0], sizes = [1, 96], strides = [1, 1]} : vector<1x128xf32> to vector<1x96xf32>
    %89 = arith.negf %88 : vector<1x96xf32>
    %90 = math.exp %89 : vector<1x96xf32>
    %cst_20 = arith.constant 1.000000e+00 : f32
    %91 = vector.broadcast %cst_20 : f32 to vector<1x96xf32>
    %92 = arith.addf %91, %90 : vector<1x96xf32>
    %93 = arith.divf %91, %92 : vector<1x96xf32>
    %94 = vector.extract_strided_slice %93 {offsets = [0, 0], sizes = [1, 32], strides = [1, 1]} : vector<1x96xf32> to vector<1x32xf32>
    %95 = vector.extract_strided_slice %93 {offsets = [0, 32], sizes = [1, 32], strides = [1, 1]} : vector<1x96xf32> to vector<1x32xf32>
    %96 = vector.extract_strided_slice %93 {offsets = [0, 64], sizes = [1, 32], strides = [1, 1]} : vector<1x96xf32> to vector<1x32xf32>
    %97 = vector.extract_strided_slice %87 {offsets = [0, 96], sizes = [1, 32], strides = [1, 1]} : vector<1x128xf32> to vector<1x32xf32>
    %98 = math.tanh %97 : vector<1x32xf32>
    %99 = arith.mulf %95, %82 : vector<1x32xf32>
    %100 = arith.mulf %94, %98 : vector<1x32xf32>
    %101 = arith.addf %99, %100 : vector<1x32xf32>
    %102 = math.tanh %101 : vector<1x32xf32>
    %103 = arith.mulf %96, %102 : vector<1x32xf32>
    %104 = vector.extract_strided_slice %5 {offsets = [5, 0], sizes = [1, 128], strides = [1, 1]} : vector<8x128xf32> to vector<1x128xf32>
    %cst_21 = arith.constant dense<0.000000e+00> : vector<1x128xf32>
    %105 = tpu.matmul %103, %6, %cst_21 {dimension_numbers = #tpu.dot_dimension_numbers<[1], [0], [0], [1], [0, 0, 1, 1], [], []>} : vector<1x32xf32>, vector<32x128xf32>, vector<1x128xf32> -> vector<1x128xf32>
    %106 = arith.addf %104, %105 : vector<1x128xf32>
    %107 = vector.extract_strided_slice %106 {offsets = [0, 0], sizes = [1, 96], strides = [1, 1]} : vector<1x128xf32> to vector<1x96xf32>
    %108 = arith.negf %107 : vector<1x96xf32>
    %109 = math.exp %108 : vector<1x96xf32>
    %cst_22 = arith.constant 1.000000e+00 : f32
    %110 = vector.broadcast %cst_22 : f32 to vector<1x96xf32>
    %111 = arith.addf %110, %109 : vector<1x96xf32>
    %112 = arith.divf %110, %111 : vector<1x96xf32>
    %113 = vector.extract_strided_slice %112 {offsets = [0, 0], sizes = [1, 32], strides = [1, 1]} : vector<1x96xf32> to vector<1x32xf32>
    %114 = vector.extract_strided_slice %112 {offsets = [0, 32], sizes = [1, 32], strides = [1, 1]} : vector<1x96xf32> to vector<1x32xf32>
    %115 = vector.extract_strided_slice %112 {offsets = [0, 64], sizes = [1, 32], strides = [1, 1]} : vector<1x96xf32> to vector<1x32xf32>
    %116 = vector.extract_strided_slice %106 {offsets = [0, 96], sizes = [1, 32], strides = [1, 1]} : vector<1x128xf32> to vector<1x32xf32>
    %117 = math.tanh %116 : vector<1x32xf32>
    %118 = arith.mulf %114, %101 : vector<1x32xf32>
    %119 = arith.mulf %113, %117 : vector<1x32xf32>
    %120 = arith.addf %118, %119 : vector<1x32xf32>
    %121 = math.tanh %120 : vector<1x32xf32>
    %122 = arith.mulf %115, %121 : vector<1x32xf32>
    %123 = vector.extract_strided_slice %5 {offsets = [6, 0], sizes = [1, 128], strides = [1, 1]} : vector<8x128xf32> to vector<1x128xf32>
    %cst_23 = arith.constant dense<0.000000e+00> : vector<1x128xf32>
    %124 = tpu.matmul %122, %6, %cst_23 {dimension_numbers = #tpu.dot_dimension_numbers<[1], [0], [0], [1], [0, 0, 1, 1], [], []>} : vector<1x32xf32>, vector<32x128xf32>, vector<1x128xf32> -> vector<1x128xf32>
    %125 = arith.addf %123, %124 : vector<1x128xf32>
    %126 = vector.extract_strided_slice %125 {offsets = [0, 0], sizes = [1, 96], strides = [1, 1]} : vector<1x128xf32> to vector<1x96xf32>
    %127 = arith.negf %126 : vector<1x96xf32>
    %128 = math.exp %127 : vector<1x96xf32>
    %cst_24 = arith.constant 1.000000e+00 : f32
    %129 = vector.broadcast %cst_24 : f32 to vector<1x96xf32>
    %130 = arith.addf %129, %128 : vector<1x96xf32>
    %131 = arith.divf %129, %130 : vector<1x96xf32>
    %132 = vector.extract_strided_slice %131 {offsets = [0, 0], sizes = [1, 32], strides = [1, 1]} : vector<1x96xf32> to vector<1x32xf32>
    %133 = vector.extract_strided_slice %131 {offsets = [0, 32], sizes = [1, 32], strides = [1, 1]} : vector<1x96xf32> to vector<1x32xf32>
    %134 = vector.extract_strided_slice %131 {offsets = [0, 64], sizes = [1, 32], strides = [1, 1]} : vector<1x96xf32> to vector<1x32xf32>
    %135 = vector.extract_strided_slice %125 {offsets = [0, 96], sizes = [1, 32], strides = [1, 1]} : vector<1x128xf32> to vector<1x32xf32>
    %136 = math.tanh %135 : vector<1x32xf32>
    %137 = arith.mulf %133, %120 : vector<1x32xf32>
    %138 = arith.mulf %132, %136 : vector<1x32xf32>
    %139 = arith.addf %137, %138 : vector<1x32xf32>
    %140 = math.tanh %139 : vector<1x32xf32>
    %141 = arith.mulf %134, %140 : vector<1x32xf32>
    %142 = vector.extract_strided_slice %5 {offsets = [7, 0], sizes = [1, 128], strides = [1, 1]} : vector<8x128xf32> to vector<1x128xf32>
    %cst_25 = arith.constant dense<0.000000e+00> : vector<1x128xf32>
    %143 = tpu.matmul %141, %6, %cst_25 {dimension_numbers = #tpu.dot_dimension_numbers<[1], [0], [0], [1], [0, 0, 1, 1], [], []>} : vector<1x32xf32>, vector<32x128xf32>, vector<1x128xf32> -> vector<1x128xf32>
    %144 = arith.addf %142, %143 : vector<1x128xf32>
    %145 = vector.extract_strided_slice %144 {offsets = [0, 0], sizes = [1, 96], strides = [1, 1]} : vector<1x128xf32> to vector<1x96xf32>
    %146 = arith.negf %145 : vector<1x96xf32>
    %147 = math.exp %146 : vector<1x96xf32>
    %cst_26 = arith.constant 1.000000e+00 : f32
    %148 = vector.broadcast %cst_26 : f32 to vector<1x96xf32>
    %149 = arith.addf %148, %147 : vector<1x96xf32>
    %150 = arith.divf %148, %149 : vector<1x96xf32>
    %151 = vector.extract_strided_slice %150 {offsets = [0, 0], sizes = [1, 32], strides = [1, 1]} : vector<1x96xf32> to vector<1x32xf32>
    %152 = vector.extract_strided_slice %150 {offsets = [0, 32], sizes = [1, 32], strides = [1, 1]} : vector<1x96xf32> to vector<1x32xf32>
    %153 = vector.extract_strided_slice %150 {offsets = [0, 64], sizes = [1, 32], strides = [1, 1]} : vector<1x96xf32> to vector<1x32xf32>
    %154 = vector.extract_strided_slice %144 {offsets = [0, 96], sizes = [1, 32], strides = [1, 1]} : vector<1x128xf32> to vector<1x32xf32>
    %155 = math.tanh %154 : vector<1x32xf32>
    %156 = arith.mulf %152, %139 : vector<1x32xf32>
    %157 = arith.mulf %151, %155 : vector<1x32xf32>
    %158 = arith.addf %156, %157 : vector<1x32xf32>
    %159 = math.tanh %158 : vector<1x32xf32>
    %160 = arith.mulf %153, %159 : vector<1x32xf32>
    %161 = tpu.concatenate %27, %46, %65, %84, %103, %122, %141, %160 in 0 : vector<1x32xf32>, vector<1x32xf32>, vector<1x32xf32>, vector<1x32xf32>, vector<1x32xf32>, vector<1x32xf32>, vector<1x32xf32>, vector<1x32xf32> -> vector<8x32xf32>
    %162 = tpu.concatenate %160, %141, %122, %103, %84, %65, %46, %27 in 0 : vector<1x32xf32>, vector<1x32xf32>, vector<1x32xf32>, vector<1x32xf32>, vector<1x32xf32>, vector<1x32xf32>, vector<1x32xf32>, vector<1x32xf32> -> vector<8x32xf32>
    %163 = tpu.iota {dimensions = array<i32: 1>} : vector<8x32xi32>
    %c16_i32 = arith.constant 16 : i32
    %164 = vector.broadcast %c16_i32 : i32 to vector<8x32xi32>
    %165 = arith.cmpi slt, %163, %164 : vector<8x32xi32>
    %166 = arith.select %165, %161, %162 : vector<8x32xi1>, vector<8x32xf32>
    %c0_27 = arith.constant 0 : index
    %c0_28 = arith.constant 0 : index
    %167 = vector.load %arg6[%c0_27, %c0_28] : memref<32x5xf32, #tpu.memory_space<vmem>>, vector<32x5xf32>
    %cst_29 = arith.constant dense<0.000000e+00> : vector<8x5xf32>
    %168 = tpu.matmul %166, %167, %cst_29 {dimension_numbers = #tpu.dot_dimension_numbers<[1], [0], [0], [1], [0, 0, 1, 1], [], []>} : vector<8x32xf32>, vector<32x5xf32>, vector<8x5xf32> -> vector<8x5xf32>
    %c0_30 = arith.constant 0 : index
    %c0_31 = arith.constant 0 : index
    %169 = vector.load %arg8[%c0_30, %c0_31] : memref<1x5xf32, #tpu.memory_space<vmem>>, vector<1x5xf32>
    %170 = vector.broadcast %169 : vector<1x5xf32> to vector<8x5xf32>
    %171 = arith.addf %168, %170 : vector<8x5xf32>
    %c0_32 = arith.constant 0 : index
    %c0_33 = arith.constant 0 : index
    %172 = vector.load %arg12[%c0_32, %c0_33] : memref<8x5xf32, #tpu.memory_space<vmem>>, vector<8x5xf32>
    tpu.vector_store %arg12[%c0_32, %c0_33], %171 {strides = array<i32>} : memref<8x5xf32, #tpu.memory_space<vmem>>, vector<8x5xf32>,
    %c0_34 = arith.constant 0 : index
    %c0_35 = arith.constant 0 : index
    %173 = vector.load %arg7[%c0_34, %c0_35] : memref<5x32xf32, #tpu.memory_space<vmem>>, vector<5x32xf32>
    %cst_36 = arith.constant dense<0.000000e+00> : vector<5x8xf32>
    %174 = tpu.matmul %173, %166, %cst_36 {dimension_numbers = #tpu.dot_dimension_numbers<[1], [1], [0], [0], [0, 0, 1, 0], [], []>} : vector<5x32xf32>, vector<8x32xf32>, vector<5x8xf32> -> vector<5x8xf32>
    %c0_37 = arith.constant 0 : index
    %c0_38 = arith.constant 0 : index
    %175 = vector.load %arg9[%c0_37, %c0_38] : memref<5x1xf32, #tpu.memory_space<vmem>>, vector<5x1xf32>
    %176 = vector.broadcast %175 : vector<5x1xf32> to vector<5x8xf32>
    %177 = arith.addf %174, %176 : vector<5x8xf32>
    %c0_39 = arith.constant 0 : index
    %c0_40 = arith.constant 0 : index
    %178 = vector.load %arg10[%c0_39, %c0_40] : memref<5x5xf32, #tpu.memory_space<vmem>>, vector<5x5xf32>
    %c0_41 = arith.constant 0 : index
    %c0_42 = arith.constant 0 : index
    %179 = vector.load %arg11[%c0_41, %c0_42] : memref<5x5xf32, #tpu.memory_space<vmem>>, vector<5x5xf32>
    %180 = tpu.iota {dimensions = array<i32: 1>} : vector<1x5xi32>
    %181 = tpu.iota {dimensions = array<i32: 0>} : vector<5x1xi32>
    %182 = tpu.iota {dimensions = array<i32: 1>} : vector<5x5xi32>
    %183 = tpu.iota {dimensions = array<i32: 0>} : vector<5x5xi32>
    %c3_i32 = arith.constant 3 : i32
    %184 = vector.broadcast %c3_i32 : i32 to vector<1x5xi32>
    %185 = arith.cmpi eq, %180, %184 : vector<1x5xi32>
    %cst_43 = arith.constant 0.000000e+00 : f32
    %cst_44 = arith.constant -1.000000e+04 : f32
    %186 = vector.broadcast %cst_43 : f32 to vector<1x5xf32>
    %187 = vector.broadcast %cst_44 : f32 to vector<1x5xf32>
    %188 = arith.select %185, %186, %187 : vector<1x5xi1>, vector<1x5xf32>
    %189 = vector.broadcast %188 : vector<1x5xf32> to vector<5x5xf32>
    %190 = arith.addf %189, %178 : vector<5x5xf32>
    %cst_45 = arith.constant dense<0xFF800000> : vector<5xf32>
    %191 = vector.multi_reduction <maximumf>, %190, %cst_45 [1] : vector<5x5xf32> to vector<5xf32>
    %192 = vector.shape_cast %191 : vector<5xf32> to vector<5x1xf32>
    %193 = vector.extract_strided_slice %177 {offsets = [0, 0], sizes = [5, 1], strides = [1, 1]} : vector<5x8xf32> to vector<5x1xf32>
    %194 = arith.addf %192, %193 : vector<5x1xf32>
    %195 = vector.broadcast %194 : vector<5x1xf32> to vector<5x5xf32>
    %196 = arith.addf %195, %179 : vector<5x5xf32>
    %cst_46 = arith.constant dense<0xFF800000> : vector<5xf32>
    %197 = vector.multi_reduction <maximumf>, %196, %cst_46 [0] : vector<5x5xf32> to vector<5xf32>
    %198 = vector.shape_cast %197 : vector<5xf32> to vector<1x5xf32>
    %199 = vector.broadcast %198 : vector<1x5xf32> to vector<5x5xf32>
    %200 = arith.cmpf oge, %196, %199 : vector<5x5xf32>
    %c5_i32 = arith.constant 5 : i32
    %201 = vector.broadcast %c5_i32 : i32 to vector<5x5xi32>
    %202 = arith.select %200, %183, %201 : vector<5x5xi1>, vector<5x5xi32>
    %cst_47 = arith.constant dense<2147483647> : vector<5xi32>
    %203 = vector.multi_reduction <minsi>, %202, %cst_47 [0] : vector<5x5xi32> to vector<5xi32>
    %204 = vector.shape_cast %203 : vector<5xi32> to vector<1x5xi32>
    %205 = vector.extract_strided_slice %171 {offsets = [1, 0], sizes = [1, 5], strides = [1, 1]} : vector<8x5xf32> to vector<1x5xf32>
    %206 = arith.addf %198, %205 : vector<1x5xf32>
    %207 = vector.broadcast %206 : vector<1x5xf32> to vector<5x5xf32>
    %208 = arith.addf %207, %178 : vector<5x5xf32>
    %cst_48 = arith.constant dense<0xFF800000> : vector<5xf32>
    %209 = vector.multi_reduction <maximumf>, %208, %cst_48 [1] : vector<5x5xf32> to vector<5xf32>
    %210 = vector.shape_cast %209 : vector<5xf32> to vector<5x1xf32>
    %211 = vector.broadcast %210 : vector<5x1xf32> to vector<5x5xf32>
    %212 = arith.cmpf oge, %208, %211 : vector<5x5xf32>
    %c5_i32_49 = arith.constant 5 : i32
    %213 = vector.broadcast %c5_i32_49 : i32 to vector<5x5xi32>
    %214 = arith.select %212, %182, %213 : vector<5x5xi1>, vector<5x5xi32>
    %cst_50 = arith.constant dense<2147483647> : vector<5xi32>
    %215 = vector.multi_reduction <minsi>, %214, %cst_50 [1] : vector<5x5xi32> to vector<5xi32>
    %216 = vector.shape_cast %215 : vector<5xi32> to vector<5x1xi32>
    %217 = vector.extract_strided_slice %177 {offsets = [0, 2], sizes = [5, 1], strides = [1, 1]} : vector<5x8xf32> to vector<5x1xf32>
    %218 = arith.addf %210, %217 : vector<5x1xf32>
    %219 = vector.broadcast %218 : vector<5x1xf32> to vector<5x5xf32>
    %220 = arith.addf %219, %179 : vector<5x5xf32>
    %cst_51 = arith.constant dense<0xFF800000> : vector<5xf32>
    %221 = vector.multi_reduction <maximumf>, %220, %cst_51 [0] : vector<5x5xf32> to vector<5xf32>
    %222 = vector.shape_cast %221 : vector<5xf32> to vector<1x5xf32>
    %223 = vector.broadcast %222 : vector<1x5xf32> to vector<5x5xf32>
    %224 = arith.cmpf oge, %220, %223 : vector<5x5xf32>
    %c5_i32_52 = arith.constant 5 : i32
    %225 = vector.broadcast %c5_i32_52 : i32 to vector<5x5xi32>
    %226 = arith.select %224, %183, %225 : vector<5x5xi1>, vector<5x5xi32>
    %cst_53 = arith.constant dense<2147483647> : vector<5xi32>
    %227 = vector.multi_reduction <minsi>, %226, %cst_53 [0] : vector<5x5xi32> to vector<5xi32>
    %228 = vector.shape_cast %227 : vector<5xi32> to vector<1x5xi32>
    %229 = vector.extract_strided_slice %171 {offsets = [3, 0], sizes = [1, 5], strides = [1, 1]} : vector<8x5xf32> to vector<1x5xf32>
    %230 = arith.addf %222, %229 : vector<1x5xf32>
    %231 = vector.broadcast %230 : vector<1x5xf32> to vector<5x5xf32>
    %232 = arith.addf %231, %178 : vector<5x5xf32>
    %cst_54 = arith.constant dense<0xFF800000> : vector<5xf32>
    %233 = vector.multi_reduction <maximumf>, %232, %cst_54 [1] : vector<5x5xf32> to vector<5xf32>
    %234 = vector.shape_cast %233 : vector<5xf32> to vector<5x1xf32>
    %235 = vector.broadcast %234 : vector<5x1xf32> to vector<5x5xf32>
    %236 = arith.cmpf oge, %232, %235 : vector<5x5xf32>
    %c5_i32_55 = arith.constant 5 : i32
    %237 = vector.broadcast %c5_i32_55 : i32 to vector<5x5xi32>
    %238 = arith.select %236, %182, %237 : vector<5x5xi1>, vector<5x5xi32>
    %cst_56 = arith.constant dense<2147483647> : vector<5xi32>
    %239 = vector.multi_reduction <minsi>, %238, %cst_56 [1] : vector<5x5xi32> to vector<5xi32>
    %240 = vector.shape_cast %239 : vector<5xi32> to vector<5x1xi32>
    %241 = vector.extract_strided_slice %177 {offsets = [0, 4], sizes = [5, 1], strides = [1, 1]} : vector<5x8xf32> to vector<5x1xf32>
    %242 = arith.addf %234, %241 : vector<5x1xf32>
    %243 = vector.broadcast %242 : vector<5x1xf32> to vector<5x5xf32>
    %244 = arith.addf %243, %179 : vector<5x5xf32>
    %cst_57 = arith.constant dense<0xFF800000> : vector<5xf32>
    %245 = vector.multi_reduction <maximumf>, %244, %cst_57 [0] : vector<5x5xf32> to vector<5xf32>
    %246 = vector.shape_cast %245 : vector<5xf32> to vector<1x5xf32>
    %247 = vector.broadcast %246 : vector<1x5xf32> to vector<5x5xf32>
    %248 = arith.cmpf oge, %244, %247 : vector<5x5xf32>
    %c5_i32_58 = arith.constant 5 : i32
    %249 = vector.broadcast %c5_i32_58 : i32 to vector<5x5xi32>
    %250 = arith.select %248, %183, %249 : vector<5x5xi1>, vector<5x5xi32>
    %cst_59 = arith.constant dense<2147483647> : vector<5xi32>
    %251 = vector.multi_reduction <minsi>, %250, %cst_59 [0] : vector<5x5xi32> to vector<5xi32>
    %252 = vector.shape_cast %251 : vector<5xi32> to vector<1x5xi32>
    %253 = vector.extract_strided_slice %171 {offsets = [5, 0], sizes = [1, 5], strides = [1, 1]} : vector<8x5xf32> to vector<1x5xf32>
    %254 = arith.addf %246, %253 : vector<1x5xf32>
    %255 = vector.broadcast %254 : vector<1x5xf32> to vector<5x5xf32>
    %256 = arith.addf %255, %178 : vector<5x5xf32>
    %cst_60 = arith.constant dense<0xFF800000> : vector<5xf32>
    %257 = vector.multi_reduction <maximumf>, %256, %cst_60 [1] : vector<5x5xf32> to vector<5xf32>
    %258 = vector.shape_cast %257 : vector<5xf32> to vector<5x1xf32>
    %259 = vector.broadcast %258 : vector<5x1xf32> to vector<5x5xf32>
    %260 = arith.cmpf oge, %256, %259 : vector<5x5xf32>
    %c5_i32_61 = arith.constant 5 : i32
    %261 = vector.broadcast %c5_i32_61 : i32 to vector<5x5xi32>
    %262 = arith.select %260, %182, %261 : vector<5x5xi1>, vector<5x5xi32>
    %cst_62 = arith.constant dense<2147483647> : vector<5xi32>
    %263 = vector.multi_reduction <minsi>, %262, %cst_62 [1] : vector<5x5xi32> to vector<5xi32>
    %264 = vector.shape_cast %263 : vector<5xi32> to vector<5x1xi32>
    %265 = vector.extract_strided_slice %177 {offsets = [0, 6], sizes = [5, 1], strides = [1, 1]} : vector<5x8xf32> to vector<5x1xf32>
    %266 = arith.addf %258, %265 : vector<5x1xf32>
    %267 = vector.broadcast %266 : vector<5x1xf32> to vector<5x5xf32>
    %268 = arith.addf %267, %179 : vector<5x5xf32>
    %cst_63 = arith.constant dense<0xFF800000> : vector<5xf32>
    %269 = vector.multi_reduction <maximumf>, %268, %cst_63 [0] : vector<5x5xf32> to vector<5xf32>
    %270 = vector.shape_cast %269 : vector<5xf32> to vector<1x5xf32>
    %271 = vector.broadcast %270 : vector<1x5xf32> to vector<5x5xf32>
    %272 = arith.cmpf oge, %268, %271 : vector<5x5xf32>
    %c5_i32_64 = arith.constant 5 : i32
    %273 = vector.broadcast %c5_i32_64 : i32 to vector<5x5xi32>
    %274 = arith.select %272, %183, %273 : vector<5x5xi1>, vector<5x5xi32>
    %cst_65 = arith.constant dense<2147483647> : vector<5xi32>
    %275 = vector.multi_reduction <minsi>, %274, %cst_65 [0] : vector<5x5xi32> to vector<5xi32>
    %276 = vector.shape_cast %275 : vector<5xi32> to vector<1x5xi32>
    %277 = vector.extract_strided_slice %171 {offsets = [7, 0], sizes = [1, 5], strides = [1, 1]} : vector<8x5xf32> to vector<1x5xf32>
    %278 = arith.addf %270, %277 : vector<1x5xf32>
    %279 = vector.extract_strided_slice %178 {offsets = [4, 0], sizes = [1, 5], strides = [1, 1]} : vector<5x5xf32> to vector<1x5xf32>
    %280 = arith.addf %278, %279 : vector<1x5xf32>
    %cst_66 = arith.constant dense<0xFF800000> : vector<1xf32>
    %281 = vector.multi_reduction <maximumf>, %280, %cst_66 [1] : vector<1x5xf32> to vector<1xf32>
    %282 = vector.shape_cast %281 : vector<1xf32> to vector<1x1xf32>
    %283 = vector.broadcast %282 : vector<1x1xf32> to vector<1x5xf32>
    %284 = arith.cmpf oge, %280, %283 : vector<1x5xf32>
    %c5_i32_67 = arith.constant 5 : i32
    %285 = vector.broadcast %c5_i32_67 : i32 to vector<1x5xi32>
    %286 = arith.select %284, %180, %285 : vector<1x5xi1>, vector<1x5xi32>
    %cst_68 = arith.constant dense<2147483647> : vector<1xi32>
    %287 = vector.multi_reduction <minsi>, %286, %cst_68 [1] : vector<1x5xi32> to vector<1xi32>
    %288 = vector.shape_cast %287 : vector<1xi32> to vector<1x1xi32>
    %c0_69 = arith.constant 0 : index
    %c0_70 = arith.constant 0 : index
    %289 = vector.load %arg13[%c0_69, %c0_70] : memref<1x1xf32, #tpu.memory_space<vmem>>, vector<1x1xf32>
    tpu.vector_store %arg13[%c0_69, %c0_70], %282 {strides = array<i32>} : memref<1x1xf32, #tpu.memory_space<vmem>>, vector<1x1xf32>,
    %290 = tpu.iota {dimensions = array<i32: 1>} : vector<1x8xi32>
    %c7_i32 = arith.constant 7 : i32
    %291 = vector.broadcast %c7_i32 : i32 to vector<1x8xi32>
    %292 = arith.cmpi eq, %290, %291 : vector<1x8xi32>
    %c0_i32 = arith.constant 0 : i32
    %293 = vector.shape_cast %288 : vector<1x1xi32> to vector<1x1xi32>
    %294 = vector.broadcast %293 : vector<1x1xi32> to vector<1x8xi32>
    %295 = vector.broadcast %c0_i32 : i32 to vector<1x8xi32>
    %296 = arith.select %292, %294, %295 : vector<1x8xi1>, vector<1x8xi32>
    %297 = vector.broadcast %288 : vector<1x1xi32> to vector<1x5xi32>
    %298 = arith.cmpi eq, %180, %297 : vector<1x5xi32>
    %c0_i32_71 = arith.constant 0 : i32
    %299 = vector.broadcast %c0_i32_71 : i32 to vector<1x5xi32>
    %300 = arith.select %298, %276, %299 : vector<1x5xi1>, vector<1x5xi32>
    %cst_72 = arith.constant dense<-2147483648> : vector<1xi32>
    %301 = vector.multi_reduction <maxsi>, %300, %cst_72 [1] : vector<1x5xi32> to vector<1xi32>
    %302 = vector.shape_cast %301 : vector<1xi32> to vector<1x1xi32>
    %c6_i32 = arith.constant 6 : i32
    %303 = vector.broadcast %c6_i32 : i32 to vector<1x8xi32>
    %304 = arith.cmpi eq, %290, %303 : vector<1x8xi32>
    %305 = vector.shape_cast %302 : vector<1x1xi32> to vector<1x1xi32>
    %306 = vector.broadcast %305 : vector<1x1xi32> to vector<1x8xi32>
    %307 = arith.select %304, %306, %296 : vector<1x8xi1>, vector<1x8xi32>
    %308 = vector.broadcast %302 : vector<1x1xi32> to vector<5x1xi32>
    %309 = arith.cmpi eq, %181, %308 : vector<5x1xi32>
    %c0_i32_73 = arith.constant 0 : i32
    %310 = vector.broadcast %c0_i32_73 : i32 to vector<5x1xi32>
    %311 = arith.select %309, %264, %310 : vector<5x1xi1>, vector<5x1xi32>
    %cst_74 = arith.constant dense<-2147483648> : vector<1xi32>
    %312 = vector.multi_reduction <maxsi>, %311, %cst_74 [0] : vector<5x1xi32> to vector<1xi32>
    %313 = vector.shape_cast %312 : vector<1xi32> to vector<1x1xi32>
    %c5_i32_75 = arith.constant 5 : i32
    %314 = vector.broadcast %c5_i32_75 : i32 to vector<1x8xi32>
    %315 = arith.cmpi eq, %290, %314 : vector<1x8xi32>
    %316 = vector.shape_cast %313 : vector<1x1xi32> to vector<1x1xi32>
    %317 = vector.broadcast %316 : vector<1x1xi32> to vector<1x8xi32>
    %318 = arith.select %315, %317, %307 : vector<1x8xi1>, vector<1x8xi32>
    %319 = vector.broadcast %313 : vector<1x1xi32> to vector<1x5xi32>
    %320 = arith.cmpi eq, %180, %319 : vector<1x5xi32>
    %c0_i32_76 = arith.constant 0 : i32
    %321 = vector.broadcast %c0_i32_76 : i32 to vector<1x5xi32>
    %322 = arith.select %320, %252, %321 : vector<1x5xi1>, vector<1x5xi32>
    %cst_77 = arith.constant dense<-2147483648> : vector<1xi32>
    %323 = vector.multi_reduction <maxsi>, %322, %cst_77 [1] : vector<1x5xi32> to vector<1xi32>
    %324 = vector.shape_cast %323 : vector<1xi32> to vector<1x1xi32>
    %c4_i32 = arith.constant 4 : i32
    %325 = vector.broadcast %c4_i32 : i32 to vector<1x8xi32>
    %326 = arith.cmpi eq, %290, %325 : vector<1x8xi32>
    %327 = vector.shape_cast %324 : vector<1x1xi32> to vector<1x1xi32>
    %328 = vector.broadcast %327 : vector<1x1xi32> to vector<1x8xi32>
    %329 = arith.select %326, %328, %318 : vector<1x8xi1>, vector<1x8xi32>
    %330 = vector.broadcast %324 : vector<1x1xi32> to vector<5x1xi32>
    %331 = arith.cmpi eq, %181, %330 : vector<5x1xi32>
    %c0_i32_78 = arith.constant 0 : i32
    %332 = vector.broadcast %c0_i32_78 : i32 to vector<5x1xi32>
    %333 = arith.select %331, %240, %332 : vector<5x1xi1>, vector<5x1xi32>
    %cst_79 = arith.constant dense<-2147483648> : vector<1xi32>
    %334 = vector.multi_reduction <maxsi>, %333, %cst_79 [0] : vector<5x1xi32> to vector<1xi32>
    %335 = vector.shape_cast %334 : vector<1xi32> to vector<1x1xi32>
    %c3_i32_80 = arith.constant 3 : i32
    %336 = vector.broadcast %c3_i32_80 : i32 to vector<1x8xi32>
    %337 = arith.cmpi eq, %290, %336 : vector<1x8xi32>
    %338 = vector.shape_cast %335 : vector<1x1xi32> to vector<1x1xi32>
    %339 = vector.broadcast %338 : vector<1x1xi32> to vector<1x8xi32>
    %340 = arith.select %337, %339, %329 : vector<1x8xi1>, vector<1x8xi32>
    %341 = vector.broadcast %335 : vector<1x1xi32> to vector<1x5xi32>
    %342 = arith.cmpi eq, %180, %341 : vector<1x5xi32>
    %c0_i32_81 = arith.constant 0 : i32
    %343 = vector.broadcast %c0_i32_81 : i32 to vector<1x5xi32>
    %344 = arith.select %342, %228, %343 : vector<1x5xi1>, vector<1x5xi32>
    %cst_82 = arith.constant dense<-2147483648> : vector<1xi32>
    %345 = vector.multi_reduction <maxsi>, %344, %cst_82 [1] : vector<1x5xi32> to vector<1xi32>
    %346 = vector.shape_cast %345 : vector<1xi32> to vector<1x1xi32>
    %c2_i32 = arith.constant 2 : i32
    %347 = vector.broadcast %c2_i32 : i32 to vector<1x8xi32>
    %348 = arith.cmpi eq, %290, %347 : vector<1x8xi32>
    %349 = vector.shape_cast %346 : vector<1x1xi32> to vector<1x1xi32>
    %350 = vector.broadcast %349 : vector<1x1xi32> to vector<1x8xi32>
    %351 = arith.select %348, %350, %340 : vector<1x8xi1>, vector<1x8xi32>
    %352 = vector.broadcast %346 : vector<1x1xi32> to vector<5x1xi32>
    %353 = arith.cmpi eq, %181, %352 : vector<5x1xi32>
    %c0_i32_83 = arith.constant 0 : i32
    %354 = vector.broadcast %c0_i32_83 : i32 to vector<5x1xi32>
    %355 = arith.select %353, %216, %354 : vector<5x1xi1>, vector<5x1xi32>
    %cst_84 = arith.constant dense<-2147483648> : vector<1xi32>
    %356 = vector.multi_reduction <maxsi>, %355, %cst_84 [0] : vector<5x1xi32> to vector<1xi32>
    %357 = vector.shape_cast %356 : vector<1xi32> to vector<1x1xi32>
    %c1_i32 = arith.constant 1 : i32
    %358 = vector.broadcast %c1_i32 : i32 to vector<1x8xi32>
    %359 = arith.cmpi eq, %290, %358 : vector<1x8xi32>
    %360 = vector.shape_cast %357 : vector<1x1xi32> to vector<1x1xi32>
    %361 = vector.broadcast %360 : vector<1x1xi32> to vector<1x8xi32>
    %362 = arith.select %359, %361, %351 : vector<1x8xi1>, vector<1x8xi32>
    %363 = vector.broadcast %357 : vector<1x1xi32> to vector<1x5xi32>
    %364 = arith.cmpi eq, %180, %363 : vector<1x5xi32>
    %c0_i32_85 = arith.constant 0 : i32
    %365 = vector.broadcast %c0_i32_85 : i32 to vector<1x5xi32>
    %366 = arith.select %364, %204, %365 : vector<1x5xi1>, vector<1x5xi32>
    %cst_86 = arith.constant dense<-2147483648> : vector<1xi32>
    %367 = vector.multi_reduction <maxsi>, %366, %cst_86 [1] : vector<1x5xi32> to vector<1xi32>
    %368 = vector.shape_cast %367 : vector<1xi32> to vector<1x1xi32>
    %c0_i32_87 = arith.constant 0 : i32
    %369 = vector.broadcast %c0_i32_87 : i32 to vector<1x8xi32>
    %370 = arith.cmpi eq, %290, %369 : vector<1x8xi32>
    %371 = vector.shape_cast %368 : vector<1x1xi32> to vector<1x1xi32>
    %372 = vector.broadcast %371 : vector<1x1xi32> to vector<1x8xi32>
    %373 = arith.select %370, %372, %362 : vector<1x8xi1>, vector<1x8xi32>
    %c0_88 = arith.constant 0 : index
    %c0_89 = arith.constant 0 : index
    %374 = vector.load %arg14[%c0_88, %c0_89] : memref<1x8xi32, #tpu.memory_space<vmem>>, vector<1x8xi32>
    tpu.vector_store %arg14[%c0_88, %c0_89], %373 {strides = array<i32>} : memref<1x8xi32, #tpu.memory_space<vmem>>, vector<1x8xi32>,
    return
  }
}

</mosaic_0001>

<bundles_post_ra>
// kernel: bilstm_crf_forward.1
= control target key start
LH: loop header
LB: loop body
LE: loop exit
PB: predicated region body
PF: predicated region fallthrough
CT: control target
= control target key end

     0   :  { %20 = vsyncpa [#allocation3], 0  ;;  %s1740_s0 = inlined_call_operand.vmem [shape: f32[8,16], index: 0, kind: input, shape index: {}]   ;;  %s1741_s1 = inlined_call_operand.vmem [shape: f32[16,128], index: 1, kind: input, shape index: {}]   ;;  %s1742_s2 = inlined_call_operand.vmem [shape: f32[1,128], index: 2, kind: input, shape index: {}]   ;;  %s1743_s3 = inlined_call_operand.vmem [shape: f32[32,128], index: 3, kind: input, shape index: {}]   ;;  %s1744_s4 = inlined_call_operand.vmem [shape: f32[1,32], index: 4, kind: input, shape index: {}]   ;;  %s1745_s5 = inlined_call_operand.vmem [shape: f32[1,32], index: 5, kind: input, shape index: {}]   ;;  %s1746_s6 = inlined_call_operand.vmem [shape: f32[32,5], index: 6, kind: input, shape index: {}]   ;;  %s1747_s7 = inlined_call_operand.vmem [shape: f32[5,32], index: 7, kind: input, shape index: {}]   ;;  %s1748_s8 = inlined_call_operand.hbm [shape: f32[1,5], index: 8, kind: input, shape index: {}]   ;;  %s1749_s9 = inlined_call_operand.vmem [shape: f32[5,1], index: 9, kind: input, shape index: {}]   ;;  %s1750_s10 = inlined_call_operand.vmem [shape: f32[5,5], index: 10, kind: input, shape index: {}]   ;;  %s1751_s11 = inlined_call_operand.vmem [shape: f32[5,5], index: 11, kind: input, shape index: {}]   ;;  %s1752_s12 = inlined_call_operand.hbm [shape: f32[8,5], index: 12, kind: output, shape index: {0}]   ;;  %s1753_s13 = inlined_call_operand.hbm [shape: f32[1,1], index: 13, kind: output, shape index: {1}]   ;;  %s1754_s14 = inlined_call_operand.hbm [shape: s32[1,8], index: 14, kind: output, shape index: {2}]  }
   0x1   :  { %21 = vsyncpa [#allocation4], 0 }
   0x2   :  { %22 = vsyncpa [#allocation7], 0  ;;  %s44_s15 = sshll.u32 %s1748_s8, 4  ;;  %s1354_s16 = smov [#allocation2]   ;;  %s45_s15 = int_to_ptr.hbm [resolvable:$true] %s44_s15 }
   0x3   :  { %s46_s17 = sshll.u32 %s1354_s16, 4  ;;  %s47_s17 = int_to_ptr.vmem [resolvable:$true] %s46_s17 }
   0x4   :  { %49 = dma.hbm_to_vmem [thread:$0]  %s45_s15, 16, %s47_s17, [#allocation3]  }
   0x5   :  { %1348 = dma.done.wait [#allocation3], 16  }
   0x6   :  { %1349 = vsyncadd [#allocation3], 4294967280  ;;  %v94_v0 = vld [vmem:[%s1743_s3 + $0x18] sm:$0xff]  ;;  %v62_v1 = vld [vmem:[%s1741_s1 + $0x8] sm:$0xff]  ;;  %vm67_vm0 = vcmask 130048   ;;  %vm97_vm1 = vcmask 261120  }
   0x7   :  { %v93_v2 = vld [vmem:[%s1743_s3 + $0x10] sm:$0xff]  ;;  %113 = vmatpush.msra.mxu1 %v94_v0  ;;  %85 = vmatpush.msra.mxu0 %v62_v1  ;;  %v61_v3 = vld [vmem:[%s1741_s1] sm:$0xff]  ;;  %v92_v5 = vld [vmem:[%s1743_s3 + $0x8] sm:$0xff]  ;;  %vm653_vm14 = vcmask 1040384   ;;  %vm655_vm15 = vcmask 1041408   ;;  %s1118_s1 = sshll.u32 %s1753_s13, 4  ;;  %s1119_s1 = int_to_ptr.hbm [resolvable:$true] %s1118_s1 }
   0x8   :  { %v60_v4 = vld [vmem:[%s1740_s0] sm:$0xff]  ;;  %181 = vmatpush.msra.mxu2 %v94_v0  ;;  %251 = vmatpush.msra.mxu3 %v94_v0  ;;  %s1364_s13 = smov [#allocation8]  }
   0x9   :  { %114 = vmatpush.msra.mxu1 %v93_v2  ;;  %86 = vmatpush.msra.mxu0 %v61_v3  ;;  %v91_v6 = vld [vmem:[%s1743_s3] sm:$0xff]  ;;  %s1107_s3 = sshll.u32 %s1752_s12, 4  ;;  %s1127_s17 = sshll.u32 %s1364_s13, 4  ;;  %s1108_s3 = int_to_ptr.hbm [resolvable:$true] %s1107_s3  ;;  %s1128_s17 = int_to_ptr.vmem [resolvable:$true] %s1127_s17 }
   0xa   :  { %1148 = vmatmul.msk.f32.vlgmr.msra.gmra.mxu0 %vm67_vm0, %v60_v4  ;;  %182 = vmatpush.msra.mxu2 %v93_v2  ;;  %v95_v7 = vld [vmem:[%s1744_s4] sm:$0x1]  ;;  %s1355_s4 = smov 32   ;;  %s1129_s12 = sshll.u32 %s1754_s14, 4  ;;  %s1130_s12 = int_to_ptr.hbm [resolvable:$true] %s1129_s12 }
   0xb   :  { %115 = vmatpush.msra.mxu1 %v92_v5  ;;  %252 = vmatpush.msra.mxu3 %v93_v2  ;;  %v1185_v8 = vld [vmem:[%s1742_s2] ss:$0 sm:$0xff]  ;;  %s1356_s2 = smov 64  }
   0xc   :  { %183 = vmatpush.msra.mxu2 %v92_v5  ;;  %321 = vmatpush.msrb.mxu0 %v94_v0  ;;  %v1186_v14 = vld [vmem:[%s1745_s5] ss:$0 sm:$0xff] }
   0xd   :  { %116 = vmatpush.msra.mxu1 %v91_v6  ;;  %253 = vmatpush.msra.mxu3 %v92_v5 }
   0xe   :  { %1149 = vmatmul.msk.f32.vlgmr.msra.gmra.mxu1 %vm97_vm1, %v95_v7  ;;  %184 = vmatpush.msra.mxu2 %v91_v6 }
   0xf   :  { %254 = vmatpush.msra.mxu3 %v91_v6  ;;  %322 = vmatpush.msrb.mxu0 %v93_v2 }
  0x10   :  { %391 = vmatpush.msrb.mxu1 %v94_v0  ;;  %461 = vmatpush.msrb.mxu2 %v94_v0 }
  0x11   :  { %323 = vmatpush.msrb.mxu0 %v92_v5  ;;  %531 = vmatpush.msrb.mxu3 %v94_v0 }
  0x12   :  { %392 = vmatpush.msrb.mxu1 %v93_v2  ;;  %462 = vmatpush.msrb.mxu2 %v93_v2 }
  0x13   :  { %324 = vmatpush.msrb.mxu0 %v91_v6  ;;  %532 = vmatpush.msrb.mxu3 %v93_v2 }
  0x14   :  { %393 = vmatpush.msrb.mxu1 %v92_v5  ;;  %463 = vmatpush.msrb.mxu2 %v92_v5 }
  0x15   :  { %533 = vmatpush.msrb.mxu3 %v92_v5  ;;  %601 = vmatpush.msra.mxu0 %v94_v0 }
  0x16   :  { %394 = vmatpush.msrb.mxu1 %v91_v6  ;;  %464 = vmatpush.msrb.mxu2 %v91_v6 }
  0x17   :  { %534 = vmatpush.msrb.mxu3 %v91_v6  ;;  %602 = vmatpush.msra.mxu0 %v93_v2 }
  0x19   :  { %603 = vmatpush.msra.mxu0 %v92_v5 }
  0x1b   :  { %604 = vmatpush.msra.mxu0 %v91_v6 }
  0x87   :  { %v88_v9 = vpop.f32.mrf.mxu0 }
  0x88   :  { %v1471_v10 = vadd.f32 %v1185_v8, %v88_v9 }
  0x8b   :  { %v118_v11 = vpop.f32.mrf.mxu1 }
  0x8c   :  { %v121_v12 = vadd.f32 %v118_v11, %v1471_v10 }
  0x8e   :  { %1188 = vtanh.f32 %v121_v12  ;;  %v1150_v15 = vmul.f32 -1.442695, %v121_v12 }
  0x90   :  { %1190 = vpow2.f32 %v1150_v15 }
  0x94   :  { %v1189_v13 = vpop.eup %1188 }
  0x95   :  { %149 = vrot.lane.b32.xlu0 %v1189_v13, %s1355_s4 }
  0x96   :  { %v1191_v16 = vpop.eup %1190 }
  0x97   :  { %v125_v17 = vadd.f32 1.0, %v1191_v16 }
  0x99   :  { %1192 = vrcp.f32 %v125_v17  ;;  %v137_v23 = vand.u32 2147483648, %v125_v17  ;;  %vm131_vm3 = vweird.f32 %v125_v17  ;;  %v135_v24 = vand.u32 2147483647, %v125_v17 }
  0x9b   :  { %v138_v26 = vor.u32 1.1754944e-38, %v137_v23  ;;  %vm136_vm5 = vcmp.eq.f32.partialorder %v135_v24, 8.507059e+37 }
  0x9d   :  { %144 = vrot.lane.b32.xlu0 %v1186_v14, %s1355_s4 }
  0x9f   :  { %v1193_v18 = vpop.eup %1192 }
  0xa0   :  { %v127_v19 = vmul.f32 %v1193_v18, %v125_v17  ;;  %vm132_vm2 = vweird.f32 %v1193_v18 }
  0xa1   :  { %vm133_vm4 = vmor %vm131_vm3, %vm132_vm2 }
  0xa2   :  { %v128_v20 = vsub.f32 1.0, %v127_v19 }
  0xa4   :  { %v129_v21 = vmul.f32 %v1193_v18, %v128_v20 }
  0xa6   :  { %v130_v22 = vadd.f32 %v1193_v18, %v129_v21 }
  0xa8   :  { %v134_v25 = vsel %vm133_vm4, %v1193_v18, %v130_v22 }
  0xa9   :  { %v139_v28 = vsel %vm136_vm5, %v138_v26, %v134_v25  ;;  %vm657_vm5 = vcmask 1042432  }
 0x107   :  { %v150_v27 = vpop.permute.xlu0 %149 }
 0x108   :  { %v152_v29 = vmul.f32 %v150_v27, %v139_v28 }
 0x10a   :  { %154 = vrot.lane.b32.xlu1 %v152_v29, %s1355_s4 }
 0x10f   :  { %v145_v30 = vpop.permute.xlu0 %144 }
 0x110   :  { %v147_v31 = vmul.f32 %v145_v30, %v139_v28 }
 0x17c   :  { %v155_v32 = vpop.permute.xlu1 %154 }
 0x17d   :  { %v157_v33 = vadd.f32 %v155_v32, %v147_v31 }
 0x17f   :  { %1194 = vtanh.f32 %v157_v33  ;;  %v214_v57 = vrot.slane %v157_v33, 7 }
 0x185   :  { %v1195_v34 = vpop.eup %1194 }
 0x186   :  { %160 = vrot.lane.b32.xlu1 %v1195_v34, %s1355_s4 }
 0x1f8   :  { %v161_v35 = vpop.permute.xlu1 %160 }
 0x1f9   :  { %v1481_v36 = vmul.f32 %v161_v35, %v139_v28 }
 0x1fb   :  { %165 = vrot.lane.b32.xlu2 %v1481_v36, %s1356_s2 }
 0x255   :  { %v166_v37 = vpop.permute.xlu2 %165 }
 0x256   :  { %1151 = vmatmul.msk.f32.vlgmr.msra.gmra.mxu2 %vm97_vm1, %v166_v37 }
 0x2d9   :  { %v186_v38 = vpop.f32.mrf.mxu2 }
 0x2da   :  { %v190_v39 = vrot.slane %v186_v38, 7 }
 0x2dc   :  { %v192_v40 = vadd.f32 %v190_v39, %v1471_v10 }
 0x2de   :  { %1196 = vtanh.f32 %v192_v40  ;;  %v1152_v42 = vmul.f32 -1.442695, %v192_v40 }
 0x2e0   :  { %1198 = vpow2.f32 %v1152_v42 }
 0x2e4   :  { %v1197_v41 = vpop.eup %1196 }
 0x2e5   :  { %218 = vrot.lane.b32.xlu2 %v1197_v41, %s1355_s4 }
 0x2e6   :  { %v1199_v43 = vpop.eup %1198 }
 0x2e7   :  { %v196_v44 = vadd.f32 1.0, %v1199_v43 }
 0x2e9   :  { %1200 = vrcp.f32 %v196_v44  ;;  %v208_v50 = vand.u32 2147483648, %v196_v44  ;;  %vm202_vm7 = vweird.f32 %v196_v44  ;;  %v206_v51 = vand.u32 2147483647, %v196_v44 }
 0x2eb   :  { %v209_v53 = vor.u32 1.1754944e-38, %v208_v50  ;;  %vm207_vm9 = vcmp.eq.f32.partialorder %v206_v51, 8.507059e+37 }
 0x2ef   :  { %v1201_v45 = vpop.eup %1200 }
 0x2f0   :  { %v198_v46 = vmul.f32 %v1201_v45, %v196_v44  ;;  %vm203_vm6 = vweird.f32 %v1201_v45 }
 0x2f1   :  { %vm204_vm8 = vmor %vm202_vm7, %vm203_vm6 }
 0x2f2   :  { %v199_v47 = vsub.f32 1.0, %v198_v46 }
 0x2f4   :  { %v200_v48 = vmul.f32 %v1201_v45, %v199_v47 }
 0x2f6   :  { %v201_v49 = vadd.f32 %v1201_v45, %v200_v48 }
 0x2f8   :  { %v205_v52 = vsel %vm204_vm8, %v1201_v45, %v201_v49 }
 0x2f9   :  { %v210_v55 = vsel %vm207_vm9, %v209_v53, %v205_v52 }
 0x2fa   :  { %v216_v58 = vmul.f32 %v214_v57, %v210_v55 }
 0x33f   :  { %v219_v54 = vpop.permute.xlu2 %218 }
 0x340   :  { %v221_v56 = vmul.f32 %v219_v54, %v210_v55 }
 0x342   :  { %223 = vrot.lane.b32.xlu0 %v221_v56, %s1355_s4 }
 0x3b4   :  { %v224_v59 = vpop.permute.xlu0 %223 }
 0x3b5   :  { %v226_v60 = vadd.f32 %v224_v59, %v216_v58 }
 0x3b7   :  { %1202 = vtanh.f32 %v226_v60  ;;  %v284_v22 = vrot.slane %v226_v60, 7 }
 0x3bd   :  { %v1203_v61 = vpop.eup %1202 }
 0x3be   :  { %229 = vrot.lane.b32.xlu1 %v1203_v61, %s1355_s4 }
 0x430   :  { %v230_v62 = vpop.permute.xlu1 %229 }
 0x431   :  { %v1490_v63 = vmul.f32 %v230_v62, %v210_v55 }
 0x433   :  { %v234_v0 = vrot.slane %v1490_v63, 1  ;;  %v654_v29 = vsel %vm653_vm14, %v1481_v36, %v1490_v63 }
 0x435   :  { %235 = vrot.lane.b32.xlu2 %v234_v0, %s1356_s2 }
 0x48f   :  { %v236_v1 = vpop.permute.xlu2 %235 }
 0x490   :  { %1153 = vmatmul.msk.f32.vlgmr.msra.gmra.mxu3 %vm97_vm1, %v236_v1 }
 0x513   :  { %v256_v2 = vpop.f32.mrf.mxu3 }
 0x514   :  { %v260_v3 = vrot.slane %v256_v2, 6 }
 0x516   :  { %v262_v4 = vadd.f32 %v260_v3, %v1471_v10 }
 0x518   :  { %1204 = vtanh.f32 %v262_v4  ;;  %v1154_v6 = vmul.f32 -1.442695, %v262_v4 }
 0x51a   :  { %1206 = vpow2.f32 %v1154_v6 }
 0x51e   :  { %v1205_v5 = vpop.eup %1204 }
 0x51f   :  { %288 = vrot.lane.b32.xlu0 %v1205_v5, %s1355_s4 }
 0x520   :  { %v1207_v7 = vpop.eup %1206 }
 0x521   :  { %v266_v8 = vadd.f32 1.0, %v1207_v7 }
 0x523   :  { %1208 = vrcp.f32 %v266_v8  ;;  %v278_v15 = vand.u32 2147483648, %v266_v8  ;;  %vm272_vm11 = vweird.f32 %v266_v8  ;;  %v276_v16 = vand.u32 2147483647, %v266_v8 }
 0x525   :  { %v279_v18 = vor.u32 1.1754944e-38, %v278_v15  ;;  %vm277_vm13 = vcmp.eq.f32.partialorder %v276_v16, 8.507059e+37 }
 0x529   :  { %v1209_v9 = vpop.eup %1208 }
 0x52a   :  { %v268_v11 = vmul.f32 %v1209_v9, %v266_v8  ;;  %vm273_vm10 = vweird.f32 %v1209_v9 }
 0x52b   :  { %vm274_vm12 = vmor %vm272_vm11, %vm273_vm10  ;;  %vm659_vm10 = vcmask 1043456  }
 0x52c   :  { %v269_v12 = vsub.f32 1.0, %v268_v11 }
 0x52e   :  { %v270_v13 = vmul.f32 %v1209_v9, %v269_v12 }
 0x530   :  { %v271_v14 = vadd.f32 %v1209_v9, %v270_v13 }
 0x532   :  { %v275_v17 = vsel %vm274_vm12, %v1209_v9, %v271_v14 }
 0x533   :  { %v280_v20 = vsel %vm277_vm13, %v279_v18, %v275_v17 }
 0x534   :  { %v286_v23 = vmul.f32 %v284_v22, %v280_v20 }
 0x591   :  { %v289_v19 = vpop.permute.xlu0 %288 }
 0x592   :  { %v291_v21 = vmul.f32 %v289_v19, %v280_v20 }
 0x594   :  { %293 = vrot.lane.b32.xlu1 %v291_v21, %s1355_s4 }
 0x606   :  { %v294_v24 = vpop.permute.xlu1 %293 }
 0x607   :  { %v296_v25 = vadd.f32 %v294_v24, %v286_v23 }
 0x609   :  { %1210 = vtanh.f32 %v296_v25  ;;  %v354_v53 = vrot.slane %v296_v25, 7 }
 0x60f   :  { %v1211_v26 = vpop.eup %1210 }
 0x610   :  { %299 = vrot.lane.b32.xlu2 %v1211_v26, %s1355_s4 }
 0x66a   :  { %v300_v27 = vpop.permute.xlu2 %299 }
 0x66b   :  { %v1499_v28 = vmul.f32 %v300_v27, %v280_v20 }
 0x66d   :  { %v656_v30 = vsel %vm655_vm15, %v654_v29, %v1499_v28  ;;  %v304_v31 = vrot.slane %v1499_v28, 2 }
 0x66f   :  { %305 = vrot.lane.b32.xlu0 %v304_v31, %s1356_s2 }
 0x6e1   :  { %v306_v32 = vpop.permute.xlu0 %305 }
 0x6e2   :  { %1155 = vmatmul.msk.f32.vlgmr.msrb.gmra.mxu0 %vm97_vm1, %v306_v32 }
 0x75f   :  { %v326_v33 = vpop.f32.mrf.mxu0 }
 0x760   :  { %v330_v34 = vrot.slane %v326_v33, 5 }
 0x762   :  { %v332_v35 = vadd.f32 %v330_v34, %v1471_v10 }
 0x764   :  { %1212 = vtanh.f32 %v332_v35  ;;  %v1156_v38 = vmul.f32 -1.442695, %v332_v35 }
 0x766   :  { %1214 = vpow2.f32 %v1156_v38 }
 0x76a   :  { %v1213_v37 = vpop.eup %1212 }
 0x76b   :  { %358 = vrot.lane.b32.xlu1 %v1213_v37, %s1355_s4 }
 0x76c   :  { %v1215_v39 = vpop.eup %1214 }
 0x76d   :  { %v336_v40 = vadd.f32 1.0, %v1215_v39 }
 0x76f   :  { %1216 = vrcp.f32 %v336_v40  ;;  %v348_v46 = vand.u32 2147483648, %v336_v40  ;;  %vm342_vm2 = vweird.f32 %v336_v40  ;;  %v346_v47 = vand.u32 2147483647, %v336_v40 }
 0x771   :  { %v349_v49 = vor.u32 1.1754944e-38, %v348_v46  ;;  %vm347_vm4 = vcmp.eq.f32.partialorder %v346_v47, 8.507059e+37 }
 0x775   :  { %v1217_v41 = vpop.eup %1216 }
 0x776   :  { %v338_v42 = vmul.f32 %v1217_v41, %v336_v40  ;;  %vm343_vm0 = vweird.f32 %v1217_v41 }
 0x777   :  { %vm344_vm3 = vmor %vm342_vm2, %vm343_vm0  ;;  %vm661_vm2 = vcmask 1044480  }
 0x778   :  { %v339_v43 = vsub.f32 1.0, %v338_v42 }
 0x77a   :  { %v340_v44 = vmul.f32 %v1217_v41, %v339_v43 }
 0x77c   :  { %v341_v45 = vadd.f32 %v1217_v41, %v340_v44 }
 0x77e   :  { %v345_v48 = vsel %vm344_vm3, %v1217_v41, %v341_v45 }
 0x77f   :  { %v350_v51 = vsel %vm347_vm4, %v349_v49, %v345_v48 }
 0x780   :  { %v356_v54 = vmul.f32 %v354_v53, %v350_v51 }
 0x7dd   :  { %v359_v50 = vpop.permute.xlu1 %358 }
 0x7de   :  { %v361_v52 = vmul.f32 %v359_v50, %v350_v51 }
 0x7e0   :  { %363 = vrot.lane.b32.xlu2 %v361_v52, %s1355_s4 }
 0x83a   :  { %v364_v55 = vpop.permute.xlu2 %363 }
 0x83b   :  { %v366_v56 = vadd.f32 %v364_v55, %v356_v54 }
 0x83d   :  { %1218 = vtanh.f32 %v366_v56  ;;  %v424_v20 = vrot.slane %v366_v56, 7 }
 0x843   :  { %v1219_v57 = vpop.eup %1218 }
 0x844   :  { %369 = vrot.lane.b32.xlu0 %v1219_v57, %s1355_s4 }
 0x8b6   :  { %v370_v58 = vpop.permute.xlu0 %369 }
 0x8b7   :  { %v1513_v59 = vmul.f32 %v370_v58, %v350_v51 }
 0x8b9   :  { %v658_v60 = vsel %vm657_vm5, %v656_v30, %v1513_v59  ;;  %v374_v61 = vrot.slane %v1513_v59, 3 }
 0x8bb   :  { %375 = vrot.lane.b32.xlu1 %v374_v61, %s1356_s2 }
 0x92d   :  { %v376_v62 = vpop.permute.xlu1 %375 }
 0x92e   :  { %1157 = vmatmul.msk.f32.vlgmr.msrb.gmra.mxu1 %vm97_vm1, %v376_v62 }
 0x9ab   :  { %v396_v0 = vpop.f32.mrf.mxu1 }
 0x9ac   :  { %v400_v1 = vrot.slane %v396_v0, 4 }
 0x9ae   :  { %v402_v2 = vadd.f32 %v400_v1, %v1471_v10 }
 0x9b0   :  { %1220 = vtanh.f32 %v402_v2  ;;  %v1158_v4 = vmul.f32 -1.442695, %v402_v2 }
 0x9b2   :  { %1222 = vpow2.f32 %v1158_v4 }
 0x9b6   :  { %v1221_v3 = vpop.eup %1220 }
 0x9b7   :  { %428 = vrot.lane.b32.xlu2 %v1221_v3, %s1355_s4 }
 0x9b8   :  { %v1223_v5 = vpop.eup %1222 }
 0x9b9   :  { %v406_v6 = vadd.f32 1.0, %v1223_v5 }
 0x9bb   :  { %1224 = vrcp.f32 %v406_v6  ;;  %v418_v13 = vand.u32 2147483648, %v406_v6  ;;  %vm412_vm7 = vweird.f32 %v406_v6  ;;  %v416_v14 = vand.u32 2147483647, %v406_v6 }
 0x9bd   :  { %v419_v16 = vor.u32 1.1754944e-38, %v418_v13  ;;  %vm417_vm9 = vcmp.eq.f32.partialorder %v416_v14, 8.507059e+37 }
 0x9c1   :  { %v1225_v7 = vpop.eup %1224 }
 0x9c2   :  { %v408_v8 = vmul.f32 %v1225_v7, %v406_v6  ;;  %vm413_vm6 = vweird.f32 %v1225_v7 }
 0x9c3   :  { %vm414_vm8 = vmor %vm412_vm7, %vm413_vm6 }
 0x9c4   :  { %v409_v9 = vsub.f32 1.0, %v408_v8 }
 0x9c6   :  { %v410_v11 = vmul.f32 %v1225_v7, %v409_v9 }
 0x9c8   :  { %v411_v12 = vadd.f32 %v1225_v7, %v410_v11 }
 0x9ca   :  { %v415_v15 = vsel %vm414_vm8, %v1225_v7, %v411_v12  ;;  %vm663_vm8 = vcmask 1045504  }
 0x9cb   :  { %v420_v18 = vsel %vm417_vm9, %v419_v16, %v415_v15 }
 0x9cc   :  { %v426_v21 = vmul.f32 %v424_v20, %v420_v18 }
 0xa11   :  { %v429_v17 = vpop.permute.xlu2 %428 }
 0xa12   :  { %v431_v19 = vmul.f32 %v429_v17, %v420_v18 }
 0xa14   :  { %433 = vrot.lane.b32.xlu0 %v431_v19, %s1355_s4 }
 0xa86   :  { %v434_v22 = vpop.permute.xlu0 %433 }
 0xa87   :  { %v436_v23 = vadd.f32 %v434_v22, %v426_v21 }
 0xa89   :  { %1226 = vtanh.f32 %v436_v23  ;;  %v494_v51 = vrot.slane %v436_v23, 7 }
 0xa8f   :  { %v1227_v24 = vpop.eup %1226 }
 0xa90   :  { %439 = vrot.lane.b32.xlu1 %v1227_v24, %s1355_s4 }
 0xb02   :  { %v440_v25 = vpop.permute.xlu1 %439 }
 0xb03   :  { %v1524_v26 = vmul.f32 %v440_v25, %v420_v18 }
 0xb05   :  { %v660_v27 = vsel %vm659_vm10, %v658_v60, %v1524_v26  ;;  %v444_v29 = vrot.slane %v1524_v26, 4 }
 0xb07   :  { %445 = vrot.lane.b32.xlu2 %v444_v29, %s1356_s2 }
 0xb61   :  { %v446_v30 = vpop.permute.xlu2 %445 }
 0xb62   :  { %1159 = vmatmul.msk.f32.vlgmr.msrb.gmra.mxu2 %vm97_vm1, %v446_v30 }
 0xbe5   :  { %v466_v31 = vpop.f32.mrf.mxu2 }
 0xbe6   :  { %v470_v32 = vrot.slane %v466_v31, 3 }
 0xbe8   :  { %v472_v33 = vadd.f32 %v470_v32, %v1471_v10 }
 0xbea   :  { %1228 = vtanh.f32 %v472_v33  ;;  %v1160_v35 = vmul.f32 -1.442695, %v472_v33 }
 0xbec   :  { %1230 = vpow2.f32 %v1160_v35 }
 0xbf0   :  { %v1229_v34 = vpop.eup %1228 }
 0xbf1   :  { %498 = vrot.lane.b32.xlu0 %v1229_v34, %s1355_s4 }
 0xbf2   :  { %v1231_v37 = vpop.eup %1230 }
 0xbf3   :  { %v476_v38 = vadd.f32 1.0, %v1231_v37 }
 0xbf5   :  { %1232 = vrcp.f32 %v476_v38  ;;  %v488_v44 = vand.u32 2147483648, %v476_v38  ;;  %vm482_vm12 = vweird.f32 %v476_v38  ;;  %v486_v45 = vand.u32 2147483647, %v476_v38 }
 0xbf7   :  { %v489_v47 = vor.u32 1.1754944e-38, %v488_v44  ;;  %vm487_vm0 = vcmp.eq.f32.partialorder %v486_v45, 8.507059e+37 }
 0xbfb   :  { %v1233_v39 = vpop.eup %1232 }
 0xbfc   :  { %v478_v40 = vmul.f32 %v1233_v39, %v476_v38  ;;  %vm483_vm11 = vweird.f32 %v1233_v39 }
 0xbfd   :  { %vm484_vm13 = vmor %vm482_vm12, %vm483_vm11 }
 0xbfe   :  { %v479_v41 = vsub.f32 1.0, %v478_v40 }
 0xc00   :  { %v480_v42 = vmul.f32 %v1233_v39, %v479_v41 }
 0xc02   :  { %v481_v43 = vadd.f32 %v1233_v39, %v480_v42 }
 0xc04   :  { %v485_v46 = vsel %vm484_vm13, %v1233_v39, %v481_v43 }
 0xc05   :  { %v490_v49 = vsel %vm487_vm0, %v489_v47, %v485_v46  ;;  %vm665_vm0 = vcmask 1046528  }
 0xc06   :  { %v496_v52 = vmul.f32 %v494_v51, %v490_v49 }
 0xc63   :  { %v499_v48 = vpop.permute.xlu0 %498 }
 0xc64   :  { %v501_v50 = vmul.f32 %v499_v48, %v490_v49 }
 0xc66   :  { %503 = vrot.lane.b32.xlu1 %v501_v50, %s1355_s4 }
 0xcd8   :  { %v504_v53 = vpop.permute.xlu1 %503 }
 0xcd9   :  { %v506_v54 = vadd.f32 %v504_v53, %v496_v52 }
 0xcdb   :  { %1234 = vtanh.f32 %v506_v54  ;;  %v564_v19 = vrot.slane %v506_v54, 7 }
 0xce1   :  { %v1235_v55 = vpop.eup %1234 }
 0xce2   :  { %509 = vrot.lane.b32.xlu2 %v1235_v55, %s1355_s4 }
 0xd3c   :  { %v510_v56 = vpop.permute.xlu2 %509 }
 0xd3d   :  { %v1535_v57 = vmul.f32 %v510_v56, %v490_v49 }
 0xd3f   :  { %v662_v58 = vsel %vm661_vm2, %v660_v27, %v1535_v57  ;;  %v514_v60 = vrot.slane %v1535_v57, 5 }
 0xd41   :  { %515 = vrot.lane.b32.xlu0 %v514_v60, %s1356_s2 }
 0xdb3   :  { %v516_v61 = vpop.permute.xlu0 %515 }
 0xdb4   :  { %1161 = vmatmul.msk.f32.vlgmr.msrb.gmra.mxu3 %vm97_vm1, %v516_v61 }
 0xe37   :  { %v536_v62 = vpop.f32.mrf.mxu3 }
 0xe38   :  { %v540_v0 = vrot.slane %v536_v62, 2  ;;  %v672_v62 = vrot.slane %v1535_v57, 3  ;;  %v682_v57 = vrot.slane %v1481_v36, 1  ;;  %v704_v36 = vld [vmem:[%s1746_s6 + $0x8] sm:$0xff] }
 0xe3a   :  { %v542_v1 = vadd.f32 %v540_v0, %v1471_v10  ;;  %v674_v0 = vrot.slane %v1524_v26, 1 }
 0xe3c   :  { %1236 = vtanh.f32 %v542_v1  ;;  %v1162_v3 = vmul.f32 -1.442695, %v542_v1 }
 0xe3e   :  { %1238 = vpow2.f32 %v1162_v3 }
 0xe42   :  { %v1237_v2 = vpop.eup %1236 }
 0xe43   :  { %568 = vrot.lane.b32.xlu1 %v1237_v2, %s1355_s4  ;;  %v676_v2 = vrot.slane %v1513_v59, 7  ;;  %v691_v59 = vlaneseq }
 0xe44   :  { %v1239_v4 = vpop.eup %1238 }
 0xe45   :  { %v546_v5 = vadd.f32 1.0, %v1239_v4  ;;  %v678_v4 = vrot.slane %v1499_v28, 5  ;;  %v706_v28 = vld [vmem:[%s1746_s6 + $0x18] sm:$0xff] }
 0xe46   :  { %726 = vmatpush.msra.mxu1 %v706_v28 }
 0xe47   :  { %1240 = vrcp.f32 %v546_v5  ;;  %v558_v12 = vand.u32 2147483648, %v546_v5  ;;  %vm552_vm4 = vweird.f32 %v546_v5  ;;  %v556_v13 = vand.u32 2147483647, %v546_v5 }
 0xe49   :  { %v559_v15 = vor.u32 1.1754944e-38, %v558_v12  ;;  %vm557_vm7 = vcmp.eq.f32.partialorder %v556_v13, 8.507059e+37  ;;  %v1582_v12 = vand.u32 127, %v691_v59  ;;  %v737_v13 = vld [vmem:[%s1749_s9] sm:$0x1f] }
 0xe4d   :  { %v1241_v6 = vpop.eup %1240 }
 0xe4e   :  { %v548_v7 = vmul.f32 %v1241_v6, %v546_v5  ;;  %vm553_vm3 = vweird.f32 %v1241_v6 }
 0xe4f   :  { %vm554_vm6 = vmor %vm552_vm4, %vm553_vm3 }
 0xe50   :  { %v549_v8 = vsub.f32 1.0, %v548_v7 }
 0xe52   :  { %v550_v9 = vmul.f32 %v1241_v6, %v549_v8 }
 0xe54   :  { %v551_v11 = vadd.f32 %v1241_v6, %v550_v9 }
 0xe56   :  { %v555_v14 = vsel %vm554_vm6, %v1241_v6, %v551_v11  ;;  %v680_v6 = vrot.slane %v1490_v63, 3  ;;  %v705_v63 = vld [vmem:[%s1746_s6 + $0x10] sm:$0xff]  ;;  %v703_v11 = vld [vmem:[%s1746_s6] sm:$0xff] }
 0xe57   :  { %v560_v17 = vsel %vm557_vm7, %v559_v15, %v555_v14  ;;  %727 = vmatpush.msra.mxu1 %v705_v63  ;;  %v1590_v14 = vld [vmem:[%s1750_s10] sm:$0x1f]  ;;  %v1357_v15 = vmov 0   ;;  %vm955_vm7 = vcmask 39943  }
 0xe58   :  { %v566_v20 = vmul.f32 %v564_v19, %v560_v17  ;;  %1179 = vset.pattern.permute.xlu1 %v1357_v15  ;;  %1180 = vset.pattern.permute.xlu0 %v1357_v15 }
 0xe59   :  { %728 = vmatpush.msra.mxu1 %v704_v36 }
 0xe5b   :  { %729 = vmatpush.msra.mxu1 %v703_v11 }
 0xeb5   :  { %v569_v16 = vpop.permute.xlu1 %568 }
 0xeb6   :  { %v571_v18 = vmul.f32 %v569_v16, %v560_v17  ;;  %v1358_v16 = vmov -10000.0  }
 0xeb8   :  { %573 = vrot.lane.b32.xlu2 %v571_v18, %s1355_s4 }
 0xf12   :  { %v574_v21 = vpop.permute.xlu2 %573 }
 0xf13   :  { %v576_v22 = vadd.f32 %v574_v21, %v566_v20 }
 0xf15   :  { %1242 = vtanh.f32 %v576_v22  ;;  %v634_v50 = vrot.slane %v576_v22, 7 }
 0xf1b   :  { %v1243_v23 = vpop.eup %1242 }
 0xf1c   :  { %579 = vrot.lane.b32.xlu0 %v1243_v23, %s1355_s4  ;;  %v736_v23 = vld [vmem:[%s1747_s7] sm:$0x1f] }
 0xf8e   :  { %v580_v24 = vpop.permute.xlu0 %579 }
 0xf8f   :  { %v582_v25 = vmul.f32 %v580_v24, %v560_v17  ;;  %v1187_v24 = vld [vmem:[#allocation2] ss:$0 sm:$0xff] }
 0xf91   :  { %v584_v27 = vrot.slane %v582_v25, 6  ;;  %v664_v29 = vsel %vm663_vm8, %v662_v58, %v582_v25  ;;  %v670_v58 = vrot.slane %v582_v25, 5 }
 0xf93   :  { %585 = vrot.lane.b32.xlu1 %v584_v27, %s1356_s2 }
0x1005   :  { %v586_v30 = vpop.permute.xlu1 %585 }
0x1006   :  { %1163 = vmatmul.msk.f32.vlgmr.msra.gmra.mxu0 %vm97_vm1, %v586_v30 }
0x1083   :  { %v606_v31 = vpop.f32.mrf.mxu0 }
0x1084   :  { %v610_v32 = vrot.slane %v606_v31, 1 }
0x1086   :  { %v612_v33 = vadd.f32 %v610_v32, %v1471_v10 }
0x1088   :  { %1244 = vtanh.f32 %v612_v33  ;;  %v1164_v35 = vmul.f32 -1.442695, %v612_v33 }
0x108a   :  { %1246 = vpow2.f32 %v1164_v35 }
0x108e   :  { %v1245_v34 = vpop.eup %1244 }
0x108f   :  { %638 = vrot.lane.b32.xlu2 %v1245_v34, %s1355_s4  ;;  %v1614_v34 = vld [vmem:[%s1751_s11] sm:$0x1f]  ;;  %s1362_s11 = smov [#allocation6]  }
0x1090   :  { %v1247_v37 = vpop.eup %1246  ;;  %s1116_s28 = sshll.u32 %s1362_s11, 4  ;;  %s1117_s28 = int_to_ptr.vmem [resolvable:$true] %s1116_s28 }
0x1091   :  { %v616_v38 = vadd.f32 1.0, %v1247_v37 }
0x1093   :  { %1248 = vrcp.f32 %v616_v38  ;;  %v628_v44 = vand.u32 2147483648, %v616_v38  ;;  %vm622_vm11 = vweird.f32 %v616_v38  ;;  %v626_v45 = vand.u32 2147483647, %v616_v38 }
0x1095   :  { %v629_v46 = vor.u32 1.1754944e-38, %v628_v44  ;;  %vm627_vm13 = vcmp.eq.f32.partialorder %v626_v45, 8.507059e+37 }
0x1099   :  { %v1249_v39 = vpop.eup %1248 }
0x109a   :  { %v618_v40 = vmul.f32 %v1249_v39, %v616_v38  ;;  %vm623_vm9 = vweird.f32 %v1249_v39 }
0x109b   :  { %vm624_vm12 = vmor %vm622_vm11, %vm623_vm9 }
0x109c   :  { %v619_v41 = vsub.f32 1.0, %v618_v40 }
0x109e   :  { %v620_v42 = vmul.f32 %v1249_v39, %v619_v41 }
0x10a0   :  { %v621_v43 = vadd.f32 %v1249_v39, %v620_v42 }
0x10a2   :  { %v625_v10 = vsel %vm624_vm12, %v1249_v39, %v621_v43 }
0x10a3   :  { %v630_v48 = vsel %vm627_vm13, %v629_v46, %v625_v10 }
0x10a4   :  { %v636_v51 = vmul.f32 %v634_v50, %v630_v48 }
0x10e9   :  { %v639_v47 = vpop.permute.xlu2 %638 }
0x10ea   :  { %v641_v49 = vmul.f32 %v639_v47, %v630_v48 }
0x10ec   :  { %643 = vrot.lane.b32.xlu0 %v641_v49, %s1355_s4 }
0x115e   :  { %v644_v52 = vpop.permute.xlu0 %643 }
0x115f   :  { %v646_v53 = vadd.f32 %v644_v52, %v636_v51 }
0x1161   :  { %1250 = vtanh.f32 %v646_v53 }
0x1167   :  { %v1251_v54 = vpop.eup %1250 }
0x1168   :  { %649 = vrot.lane.b32.xlu1 %v1251_v54, %s1355_s4  ;;  %s1363_s4 = smov [#allocation5]  }
0x1169   :  { %s1105_s16 = sshll.u32 %s1363_s4, 4  ;;  %s1106_s16 = int_to_ptr.vmem [resolvable:$true] %s1105_s16 }
0x1170   :  { %740 = vperm.xlu1 %1179, %v737_v13  }
0x11da   :  { %v650_v55 = vpop.permute.xlu1 %649 }
0x11db   :  { %v652_v56 = vmul.f32 %v650_v55, %v630_v48  ;;  %v1359_v48 = vmov 2  }
0x11dd   :  { %v668_v60 = vrot.slane %v652_v56, 7  ;;  %v666_v61 = vsel %vm665_vm0, %v664_v29, %v652_v56 }
0x11de   :  { %695 = vrot.lane.b32.xlu2 %v666_v61, %s1356_s2 }
0x11df   :  { %v684_v1 = vsel %vm653_vm14, %v668_v60, %v670_v58  ;;  %vm770_vm14 = vcmp.eq.s32.totalorder %v1582_v12, 3 }
0x11e0   :  { %v685_v3 = vsel %vm655_vm15, %v684_v1, %v672_v62  ;;  %v771_v17 = vsel %vm770_vm14, 0.0, %v1358_v16  ;;  %vm773_vm15 = vcmask 36864  }
0x11e1   :  { %v686_v5 = vsel %vm657_vm5, %v685_v3, %v674_v0  ;;  %v772_v18 = vadd.f32 %v771_v17, %v1590_v14  ;;  %vm693_vm5 = vcmp.lt.s32.totalorder %v1582_v12, 16  ;;  %v1360_v3 = vmov 4  }
0x11e2   :  { %v687_v7 = vsel %vm659_vm10, %v686_v5, %v676_v2  ;;  %vm734_vm10 = vcmask 39936   ;;  %v741_v29 = vpop.permute.xlu1 %740  ;;  %1182 = vset.pattern.permute.xlu2 %v1360_v3  ;;  %v1361_v17 = vmov 6  }
0x11e3   :  { %v688_v8 = vsel %vm661_vm2, %v687_v7, %v678_v4  ;;  %v774_v19 = vsel %vm773_vm15, %v772_v18, -inf  ;;  %1183 = vset.pattern.permute.xlu1 %v1361_v17 }
0x11e4   :  { %v689_v26 = vsel %vm663_vm8, %v688_v8, %v680_v6  ;;  %vm976_vm8 = vcmask 7175  }
0x11e5   :  { %v690_v9 = vsel %vm665_vm0, %v689_v26, %v682_v57 }
0x11e6   :  { %699 = vrot.lane.b32.xlu0 %v690_v9, %s1356_s2 }
0x1207   :  { %775 = vmax.xlane.f32.xlu2 %v774_v19 }
0x1238   :  { %v696_v20 = vpop.permute.xlu2 %695 }
0x1258   :  { %v700_v21 = vpop.permute.xlu0 %699 }
0x1259   :  { %v702_v22 = vsel %vm693_vm5, %v696_v20, %v700_v21 }
0x125a   :  { %1165 = vmatmul.msk.f32.vlgmr.msra.gmra.mxu1 %vm97_vm1, %v702_v22  ;;  %1166 = vmatpush.xpose.msk.msra.mxu2 %vm97_vm1, %v702_v22 }
0x125d   :  { %1167 = vmatmul.msk.f32.vlgmr.msra.gmra.mxu2 %vm97_vm1, %v736_v23 }
0x127a   :  { %v776_v31 = vpop.xlane.xlu2 %775 }
0x12d7   :  { %v731_v25 = vpop.f32.mrf.mxu1 }
0x12d8   :  { %v1604_v27 = vadd.f32 %v1187_v24, %v731_v25 }
0x12da   :  { %735 = vst.msk [vmem:[#allocation5] sm:$0xff] %vm734_vm10, %v1604_v27 }
0x12db   :  { %1110 = dma.vmem_to_hbm [thread:$0]  %s1106_s16, 128, %s1108_s3, [#allocation4]  }
0x12e0   :  { %v763_v30 = vpop.f32.mrf.mxu2 }
0x12e1   :  { %v1608_v32 = vadd.f32 %v763_v30, %v741_v29 }
0x12e3   :  { %v777_v33 = vadd.f32 %v776_v31, %v1608_v32 }
0x12e5   :  { %780 = vperm.xlu0 %1180, %v777_v33   ;;  %v952_v33 = vrot.slane %v1590_v14, 5 }
0x12ed   :  { %1181 = vset.pattern.permute.xlu0 %v1359_v48 }
0x1357   :  { %v781_v35 = vpop.permute.xlu0 %780 }
0x1358   :  { %v1617_v37 = vadd.f32 %v781_v35, %v1614_v34 }
0x135a   :  { %v784_v38 = vsel %vm773_vm15, %v1617_v37, -inf }
0x135b   :  { %v785_v39 = vrot.slane %v784_v38, 4 }
0x135d   :  { %v786_v40 = vmax.f32 %v784_v38, %v785_v39 }
0x135f   :  { %v787_v41 = vrot.slane %v786_v40, 2 }
0x1361   :  { %v788_v42 = vmax.f32 %v786_v40, %v787_v41 }
0x1363   :  { %v789_v43 = vrot.slane %v788_v42, 1 }
0x1365   :  { %v1621_v44 = vmax.f32 %v788_v42, %v789_v43 }
0x1367   :  { %vm791_vm1 = vcmp.ge.f32.partialorder %v1617_v37, %v1621_v44  ;;  %v803_v45 = vadd.f32 %v1621_v44, %v1604_v27 }
0x1369   :  { %v804_v10 = vperm.slane %v803_v45, 1 }
0x136b   :  { %v1628_v46 = vadd.f32 %v804_v10, %v1590_v14  ;;  %v1678_v10 = vshrl.u32 %v691_v59, 7 }
0x136d   :  { %v806_v47 = vsel %vm773_vm15, %v1628_v46, -inf }
0x136e   :  { %807 = vmax.xlane.f32.xlu1 %v806_v47 }
0x13e1   :  { %v1632_v49 = vpop.xlane.xlu1 %807 }
0x13e2   :  { %v826_v50 = vadd.f32 %v1632_v49, %v1608_v32 }
0x13e4   :  { %829 = vperm.xlu0 %1181, %v826_v50  }
0x13ec   :  { %1184 = vset.pattern.permute.xlu0 %v1361_v17 }
0x1456   :  { %v830_v51 = vpop.permute.xlu0 %829 }
0x1457   :  { %v1637_v52 = vadd.f32 %v830_v51, %v1614_v34 }
0x1459   :  { %v833_v53 = vsel %vm773_vm15, %v1637_v52, -inf }
0x145a   :  { %v834_v54 = vrot.slane %v833_v53, 4 }
0x145c   :  { %v835_v55 = vmax.f32 %v833_v53, %v834_v54 }
0x145e   :  { %v836_v56 = vrot.slane %v835_v55, 2 }
0x1460   :  { %v837_v58 = vmax.f32 %v835_v55, %v836_v56 }
0x1462   :  { %v838_v60 = vrot.slane %v837_v58, 1 }
0x1464   :  { %v1641_v61 = vmax.f32 %v837_v58, %v838_v60 }
0x1466   :  { %vm840_vm3 = vcmp.ge.f32.partialorder %v1637_v52, %v1641_v61  ;;  %v852_v62 = vadd.f32 %v1641_v61, %v1604_v27 }
0x1468   :  { %v853_v0 = vperm.slane %v852_v62, 3 }
0x146a   :  { %v1648_v1 = vadd.f32 %v853_v0, %v1590_v14 }
0x146c   :  { %v855_v2 = vsel %vm773_vm15, %v1648_v1, -inf }
0x146d   :  { %856 = vmax.xlane.f32.xlu0 %v855_v2 }
0x14e0   :  { %v1652_v4 = vpop.xlane.xlu0 %856 }
0x14e1   :  { %v875_v5 = vadd.f32 %v1652_v4, %v1608_v32 }
0x14e3   :  { %878 = vperm.xlu2 %1182, %v875_v5  }
0x153d   :  { %v879_v6 = vpop.permute.xlu2 %878 }
0x153e   :  { %v1657_v7 = vadd.f32 %v879_v6, %v1614_v34 }
0x1540   :  { %v882_v57 = vsel %vm773_vm15, %v1657_v7, -inf }
0x1541   :  { %v883_v8 = vrot.slane %v882_v57, 4 }
0x1543   :  { %v884_v26 = vmax.f32 %v882_v57, %v883_v8 }
0x1545   :  { %v885_v9 = vrot.slane %v884_v26, 2 }
0x1547   :  { %v886_v28 = vmax.f32 %v884_v26, %v885_v9 }
0x1549   :  { %v887_v63 = vrot.slane %v886_v28, 1 }
0x154b   :  { %v1661_v36 = vmax.f32 %v886_v28, %v887_v63 }
0x154d   :  { %vm889_vm4 = vcmp.ge.f32.partialorder %v1657_v7, %v1661_v36  ;;  %v901_v11 = vadd.f32 %v1661_v36, %v1604_v27 }
0x154f   :  { %v902_v13 = vperm.slane %v901_v11, 5 }
0x1551   :  { %v903_v15 = vadd.f32 %v902_v13, %v1590_v14 }
0x1553   :  { %v904_v16 = vsel %vm773_vm15, %v903_v15, -inf }
0x1554   :  { %905 = vmax.xlane.f32.xlu1 %v904_v16 }
0x15c7   :  { %v906_v18 = vpop.xlane.xlu1 %905 }
0x15c8   :  { %v924_v19 = vadd.f32 %v906_v18, %v1608_v32  ;;  %vm907_vm5 = vcmp.ge.f32.partialorder %v903_v15, %v906_v18 }
0x15c9   :  { %v908_v5 = vsel %vm907_vm5, %v1582_v12, 5 }
0x15ca   :  { %927 = vperm.xlu1 %1183, %v924_v19   ;;  %v909_v8 = vsel %vm773_vm15, %v908_v5, 2147483647 }
0x15cb   :  { %v911_v26 = vshra.s32 %v909_v8, 16  ;;  %v910_v15 = vand.u32 65535, %v909_v8 }
0x15cd   :  { %v913_v9 = vcvt.s32.f32 %v911_v26  ;;  %v912_v18 = vcvt.s32.f32 %v910_v15 }
0x163c   :  { %v928_v20 = vpop.permute.xlu1 %927 }
0x163d   :  { %v930_v21 = vadd.f32 %v928_v20, %v1614_v34 }
0x163f   :  { %v931_v22 = vsel %vm773_vm15, %v930_v21, -inf }
0x1640   :  { %v932_v23 = vrot.slane %v931_v22, 4 }
0x1642   :  { %v933_v24 = vmax.f32 %v931_v22, %v932_v23  ;;  %v890_v23 = vsel %vm889_vm4, %v1678_v10, 5 }
0x1644   :  { %v934_v25 = vrot.slane %v933_v24, 2 }
0x1646   :  { %v935_v29 = vmax.f32 %v933_v24, %v934_v25 }
0x1648   :  { %v936_v30 = vrot.slane %v935_v29, 1 }
0x164a   :  { %v937_v31 = vmax.f32 %v935_v29, %v936_v30 }
0x164c   :  { %vm938_vm6 = vcmp.ge.f32.partialorder %v930_v21, %v937_v31  ;;  %v950_v35 = vadd.f32 %v937_v31, %v1604_v27 }
0x164d   :  { %v939_v47 = vsel %vm938_vm6, %v1678_v10, 5 }
0x164e   :  { %v954_v38 = vadd.f32 %v952_v33, %v950_v35  ;;  %v940_v48 = vsel %vm773_vm15, %v939_v47, 2147483647 }
0x164f   :  { %v941_v50 = vrot.slane %v940_v48, 4 }
0x1650   :  { %v956_v32 = vsel %vm955_vm7, %v954_v38, -inf }
0x1651   :  { %957 = vmax.xlane.f32.xlu2 %v956_v32  ;;  %vm942_vm12 = vcmp.lt.s32.totalorder %v940_v48, %v941_v50 }
0x1652   :  { %v943_v51 = vsel %vm942_vm12, %v940_v48, %v941_v50  ;;  %vm997_vm12 = vcmp.eq.s32.totalorder %v1582_v12, 6 }
0x1653   :  { %v944_v53 = vrot.slane %v943_v51, 2 }
0x1655   :  { %vm945_vm13 = vcmp.lt.s32.totalorder %v943_v51, %v944_v53 }
0x1656   :  { %v946_v54 = vsel %vm945_vm13, %v943_v51, %v944_v53 }
0x1657   :  { %v947_v56 = vrot.slane %v946_v54, 1 }
0x1659   :  { %vm948_vm0 = vcmp.lt.s32.totalorder %v946_v54, %v947_v56 }
0x165a   :  { %v949_v59 = vsel %vm948_vm0, %v946_v54, %v947_v56 }
0x16c4   :  { %v958_v34 = vpop.xlane.xlu2 %957 }
0x16c5   :  { %vm959_vm9 = vcmp.ge.f32.partialorder %v954_v38, %v958_v34  ;;  %977 = vst.msk [vmem:[#allocation6 - $0x7] sm:$0x80] %vm976_vm8, %v958_v34 }
0x16c6   :  { %v960_v39 = vsel %vm959_vm9, %v1582_v12, 5  ;;  %vm858_vm9 = vcmp.ge.f32.partialorder %v1648_v1, %v1652_v4  ;;  %v891_v1 = vsel %vm773_vm15, %v890_v23, 2147483647  ;;  %1121 = dma.vmem_to_hbm [thread:$0]  %s1117_s28, 16, %s1119_s1, [#allocation7]  }
0x16c7   :  { %v961_v40 = vsel %vm955_vm7, %v960_v39, 2147483647  ;;  %v859_v16 = vsel %vm858_vm9, %v1582_v12, 5  ;;  %v892_v24 = vrot.slane %v891_v1, 4 }
0x16c8   :  { %v963_v41 = vshra.s32 %v961_v40, 16  ;;  %v962_v14 = vand.u32 65535, %v961_v40  ;;  %v860_v20 = vsel %vm773_vm15, %v859_v16, 2147483647 }
0x16c9   :  { %v862_v21 = vshra.s32 %v860_v20, 16  ;;  %vm893_vm13 = vcmp.lt.s32.totalorder %v891_v1, %v892_v24 }
0x16ca   :  { %v965_v42 = vcvt.s32.f32 %v963_v41  ;;  %v964_v45 = vcvt.s32.f32 %v962_v14  ;;  %v894_v32 = vsel %vm893_vm13, %v891_v1, %v892_v24  ;;  %vm809_vm13 = vcmp.ge.f32.partialorder %v1628_v46, %v1632_v49 }
0x16cb   :  { %v864_v22 = vcvt.s32.f32 %v862_v21  ;;  %v895_v40 = vrot.slane %v894_v32, 2 }
0x16cc   :  { %966 = vmin.xlane.f32.xlu0 %v965_v42 }
0x16cd   :  { %vm896_vm0 = vcmp.lt.s32.totalorder %v894_v32, %v895_v40 }
0x16ce   :  { %v897_v48 = vsel %vm896_vm0, %v894_v32, %v895_v40 }
0x16cf   :  { %v898_v54 = vrot.slane %v897_v48, 1 }
0x16d1   :  { %vm899_vm9 = vcmp.lt.s32.totalorder %v897_v48, %v898_v54 }
0x173f   :  { %v967_v43 = vpop.xlane.xlu0 %966 }
0x1740   :  { %vm968_vm11 = vcmp.eq.f32.partialorder %v965_v42, %v967_v43  ;;  %v973_v55 = vcvt.f32.s32 %v967_v43  ;;  %v861_v42 = vand.u32 65535, %v860_v20 }
0x1741   :  { %v969_v27 = vsel %vm968_vm11, %v964_v45, inf  ;;  %vm978_vm11 = vcmp.eq.s32.totalorder %v1582_v12, 7 }
0x1742   :  { %970 = vmin.xlane.f32.xlu1 %v969_v27  ;;  %v974_v60 = vshll.u32 %v973_v55, 16  ;;  %v863_v47 = vcvt.s32.f32 %v861_v42 }
0x17b5   :  { %v971_v58 = vpop.xlane.xlu1 %970 }
0x17b6   :  { %v972_v62 = vcvt.f32.s32 %v971_v58 }
0x17b8   :  { %v975_v0 = vadd.s32 %v974_v60, %v972_v62  ;;  %v900_v60 = vsel %vm899_vm9, %v897_v48, %v898_v54 }
0x17ba   :  { %vm980_vm8 = vcmp.eq.s32.totalorder %v1582_v12, %v975_v0  ;;  %v979_v33 = vsel %vm978_vm11, %v975_v0, 0 }
0x17bb   :  { %v981_v2 = vsel %vm980_vm8, %v949_v59, 0 }
0x17bc   :  { %v982_v3 = vsel %vm955_vm7, %v981_v2, 2147483648 }
0x17bd   :  { %v984_v6 = vshra.s32 %v982_v3, 16  ;;  %v983_v28 = vand.u32 65535, %v982_v3 }
0x17bf   :  { %v986_v57 = vcvt.s32.f32 %v984_v6  ;;  %v985_v11 = vcvt.s32.f32 %v983_v28  ;;  %v810_v6 = vsel %vm809_vm13, %v1582_v12, 5 }
0x17c1   :  { %987 = vmax.xlane.f32.xlu0 %v986_v57 }
0x17c9   :  { %914 = vmin.xlane.f32.xlu0 %v913_v9 }
0x1834   :  { %v988_v63 = vpop.xlane.xlu0 %987 }
0x1835   :  { %vm989_vm6 = vcmp.eq.f32.partialorder %v986_v57, %v988_v63  ;;  %v994_v4 = vcvt.f32.s32 %v988_v63 }
0x1836   :  { %v990_v13 = vsel %vm989_vm6, %v985_v11, -inf  ;;  %v841_v11 = vsel %vm840_vm3, %v1678_v10, 5 }
0x1837   :  { %991 = vmax.xlane.f32.xlu0 %v990_v13  ;;  %v995_v29 = vshll.u32 %v994_v4, 16  ;;  %v842_v46 = vsel %vm773_vm15, %v841_v11, 2147483647 }
0x1838   :  { %v843_v49 = vrot.slane %v842_v46, 4 }
0x183a   :  { %vm844_vm0 = vcmp.lt.s32.totalorder %v842_v46, %v843_v49 }
0x183c   :  { %v915_v17 = vpop.xlane.xlu0 %914 }
0x183d   :  { %vm916_vm7 = vcmp.eq.f32.partialorder %v913_v9, %v915_v17  ;;  %v921_v35 = vcvt.f32.s32 %v915_v17  ;;  %v811_v9 = vsel %vm773_vm15, %v810_v6, 2147483647  ;;  %v845_v17 = vsel %vm844_vm0, %v842_v46, %v843_v49 }
0x183e   :  { %v917_v19 = vsel %vm916_vm7, %v912_v18, inf  ;;  %vm1012_vm7 = vcmp.eq.s32.totalorder %v1582_v12, 5  ;;  %v813_v28 = vshra.s32 %v811_v9, 16  ;;  %v846_v23 = vrot.slane %v845_v17, 2 }
0x183f   :  { %918 = vmin.xlane.f32.xlu2 %v917_v19  ;;  %v922_v36 = vshll.u32 %v921_v35, 16  ;;  %vm1063_vm0 = vcmp.eq.s32.totalorder %v1582_v12, 2 }
0x1840   :  { %v815_v63 = vcvt.s32.f32 %v813_v28 }
0x1847   :  { %865 = vmin.xlane.f32.xlu2 %v864_v22 }
0x18aa   :  { %v992_v25 = vpop.xlane.xlu0 %991 }
0x18ab   :  { %v993_v30 = vcvt.f32.s32 %v992_v25 }
0x18ad   :  { %v996_v31 = vadd.s32 %v995_v29, %v993_v30 }
0x18af   :  { %v998_v38 = vsel %vm997_vm12, %v996_v31, %v979_v33  ;;  %v999_v34 = vperm.slane %v996_v31, 7 }
0x18b1   :  { %vm1000_vm4 = vcmp.eq.s32.totalorder %v1678_v10, %v999_v34 }
0x18b2   :  { %v919_v7 = vpop.xlane.xlu2 %918 }
0x18b3   :  { %v920_v39 = vcvt.f32.s32 %v919_v7 }
0x18b5   :  { %v923_v41 = vadd.s32 %v922_v36, %v920_v39 }
0x18b7   :  { %v1001_v14 = vsel %vm1000_vm4, %v923_v41, 0 }
0x18b8   :  { %v1002_v43 = vsel %vm661_vm2, %v1001_v14, 2147483648  ;;  %v812_v14 = vand.u32 65535, %v811_v9 }
0x18b9   :  { %v1003_v45 = vrot.slane %v1002_v43, 4 }
0x18ba   :  { %v866_v27 = vpop.xlane.xlu2 %865 }
0x18bb   :  { %vm1004_vm5 = vcmp.gt.s32.totalorder %v1002_v43, %v1003_v45  ;;  %vm867_vm8 = vcmp.eq.f32.partialorder %v864_v22, %v866_v27  ;;  %v872_v16 = vcvt.f32.s32 %v866_v27 }
0x18bc   :  { %v1005_v50 = vsel %vm1004_vm5, %v1002_v43, %v1003_v45  ;;  %v868_v51 = vsel %vm867_vm8, %v863_v47, inf  ;;  %vm1031_vm5 = vcmp.eq.s32.totalorder %v1582_v12, 4  ;;  %vm847_vm8 = vcmp.lt.s32.totalorder %v845_v17, %v846_v23 }
0x18bd   :  { %v1006_v53 = vrot.slane %v1005_v50, 2  ;;  %869 = vmin.xlane.f32.xlu2 %v868_v51  ;;  %v873_v22 = vshll.u32 %v872_v16, 16  ;;  %v848_v29 = vsel %vm847_vm8, %v845_v17, %v846_v23  ;;  %v814_v43 = vcvt.s32.f32 %v812_v14 }
0x18be   :  { %v849_v33 = vrot.slane %v848_v29, 1  ;;  %v792_v51 = vsel %vm791_vm1, %v1678_v10, 5 }
0x18bf   :  { %vm1007_vm6 = vcmp.gt.s32.totalorder %v1005_v50, %v1006_v53 }
0x18c0   :  { %v1008_v55 = vsel %vm1007_vm6, %v1005_v50, %v1006_v53  ;;  %v793_v53 = vsel %vm773_vm15, %v792_v51, 2147483647 }
0x18c1   :  { %v1009_v56 = vrot.slane %v1008_v55, 1  ;;  %v794_v54 = vrot.slane %v793_v53, 4 }
0x18c3   :  { %vm1010_vm11 = vcmp.gt.s32.totalorder %v1008_v55, %v1009_v56 }
0x18c4   :  { %v1011_v58 = vsel %vm1010_vm11, %v1008_v55, %v1009_v56 }
0x18c5   :  { %v1013_v62 = vsel %vm1012_vm7, %v1011_v58, %v998_v38  ;;  %vm1014_vm12 = vcmp.eq.s32.totalorder %v1582_v12, %v1011_v58  ;;  %vm850_vm7 = vcmp.lt.s32.totalorder %v848_v29, %v849_v33 }
0x18c6   :  { %v1015_v0 = vsel %vm1014_vm12, %v900_v60, 0  ;;  %v851_v34 = vsel %vm850_vm7, %v848_v29, %v849_v33 }
0x18c7   :  { %v1016_v59 = vsel %vm734_vm10, %v1015_v0, 2147483648 }
0x18c8   :  { %v1018_v2 = vshra.s32 %v1016_v59, 16  ;;  %v1017_v5 = vand.u32 65535, %v1016_v59 }
0x18ca   :  { %v1020_v3 = vcvt.s32.f32 %v1018_v2  ;;  %v1019_v8 = vcvt.s32.f32 %v1017_v5 }
0x18cc   :  { %1021 = vmax.xlane.f32.xlu0 %v1020_v3 }
0x1930   :  { %v870_v13 = vpop.xlane.xlu2 %869 }
0x1931   :  { %v871_v18 = vcvt.f32.s32 %v870_v13 }
0x1933   :  { %v874_v4 = vadd.s32 %v873_v22, %v871_v18 }
0x193f   :  { %v1022_v57 = vpop.xlane.xlu0 %1021 }
0x1940   :  { %vm1023_vm4 = vcmp.eq.f32.partialorder %v1020_v3, %v1022_v57  ;;  %v1028_v15 = vcvt.f32.s32 %v1022_v57 }
0x1941   :  { %v1024_v26 = vsel %vm1023_vm4, %v1019_v8, -inf }
0x1942   :  { %1025 = vmax.xlane.f32.xlu0 %v1024_v26  ;;  %v1029_v20 = vshll.u32 %v1028_v15, 16 }
0x194a   :  { %816 = vmin.xlane.f32.xlu0 %v815_v63 }
0x19b5   :  { %v1026_v19 = vpop.xlane.xlu0 %1025 }
0x19b6   :  { %v1027_v21 = vcvt.f32.s32 %v1026_v19 }
0x19b8   :  { %v1030_v1 = vadd.s32 %v1029_v20, %v1027_v21 }
0x19ba   :  { %v1032_v52 = vsel %vm1031_vm5, %v1030_v1, %v1013_v62  ;;  %vm1033_vm3 = vcmp.eq.s32.totalorder %v1678_v10, %v1030_v1 }
0x19bb   :  { %v1034_v61 = vsel %vm1033_vm3, %v874_v4, 0 }
0x19bc   :  { %v1035_v24 = vsel %vm661_vm2, %v1034_v61, 2147483648 }
0x19bd   :  { %v1036_v25 = vrot.slane %v1035_v24, 4  ;;  %v817_v42 = vpop.xlane.xlu0 %816 }
0x19be   :  { %vm818_vm13 = vcmp.eq.f32.partialorder %v815_v63, %v817_v42  ;;  %v823_v58 = vcvt.f32.s32 %v817_v42 }
0x19bf   :  { %vm1037_vm6 = vcmp.gt.s32.totalorder %v1035_v24, %v1036_v25  ;;  %v819_v45 = vsel %vm818_vm13, %v814_v43, inf }
0x19c0   :  { %v1038_v30 = vsel %vm1037_vm6, %v1035_v24, %v1036_v25  ;;  %v824_v3 = vshll.u32 %v823_v58, 16  ;;  %vm1077_vm6 = vcmp.eq.s32.totalorder %v1582_v12, 1 }
0x19c1   :  { %v1039_v31 = vrot.slane %v1038_v30, 2 }
0x19c3   :  { %vm1040_vm9 = vcmp.gt.s32.totalorder %v1038_v30, %v1039_v31 }
0x19c4   :  { %v1041_v35 = vsel %vm1040_vm9, %v1038_v30, %v1039_v31 }
0x19c5   :  { %v1042_v38 = vrot.slane %v1041_v35, 1 }
0x19c7   :  { %vm1043_vm11 = vcmp.gt.s32.totalorder %v1041_v35, %v1042_v38 }
0x19c8   :  { %v1044_v32 = vsel %vm1043_vm11, %v1041_v35, %v1042_v38  ;;  %vm1098_vm11 = vcmask 64519  }
0x19c9   :  { %v1045_v7 = vsel %vm770_vm14, %v1044_v32, %v1032_v52  ;;  %vm1046_vm12 = vcmp.eq.s32.totalorder %v1582_v12, %v1044_v32  ;;  %vm795_vm14 = vcmp.lt.s32.totalorder %v793_v53, %v794_v54 }
0x19ca   :  { %v1047_v36 = vsel %vm1046_vm12, %v851_v34, 0  ;;  %v796_v60 = vsel %vm795_vm14, %v793_v53, %v794_v54 }
0x19cb   :  { %v1048_v39 = vsel %vm734_vm10, %v1047_v36, 2147483648  ;;  %v797_v5 = vrot.slane %v796_v60, 2 }
0x19cc   :  { %v1050_v40 = vshra.s32 %v1048_v39, 16  ;;  %v1049_v27 = vand.u32 65535, %v1048_v39 }
0x19cd   :  { %vm798_vm15 = vcmp.lt.s32.totalorder %v796_v60, %v797_v5 }
0x19ce   :  { %v1052_v41 = vcvt.s32.f32 %v1050_v40  ;;  %v1051_v48 = vcvt.s32.f32 %v1049_v27  ;;  %v799_v9 = vsel %vm798_vm15, %v796_v60, %v797_v5 }
0x19cf   :  { %v800_v11 = vrot.slane %v799_v9, 1 }
0x19d0   :  { %1053 = vmax.xlane.f32.xlu1 %v1052_v41 }
0x19d1   :  { %vm801_vm8 = vcmp.lt.s32.totalorder %v799_v9, %v800_v11 }
0x19d2   :  { %v802_v15 = vsel %vm801_vm8, %v799_v9, %v800_v11 }
0x19d8   :  { %820 = vmin.xlane.f32.xlu1 %v819_v45 }
0x1a43   :  { %v1054_v47 = vpop.xlane.xlu1 %1053 }
0x1a44   :  { %vm1055_vm4 = vcmp.eq.f32.partialorder %v1052_v41, %v1054_v47  ;;  %v1060_v55 = vcvt.f32.s32 %v1054_v47 }
0x1a45   :  { %v1056_v50 = vsel %vm1055_vm4, %v1051_v48, -inf }
0x1a46   :  { %1057 = vmax.xlane.f32.xlu2 %v1056_v50  ;;  %v1061_v59 = vshll.u32 %v1060_v55, 16 }
0x1a4b   :  { %v821_v56 = vpop.xlane.xlu1 %820 }
0x1a4c   :  { %v822_v62 = vcvt.f32.s32 %v821_v56 }
0x1a4e   :  { %v825_v57 = vadd.s32 %v824_v3, %v822_v62 }
0x1ab9   :  { %v1058_v0 = vpop.xlane.xlu2 %1057 }
0x1aba   :  { %v1059_v2 = vcvt.f32.s32 %v1058_v0 }
0x1abc   :  { %v1062_v6 = vadd.s32 %v1061_v59, %v1059_v2 }
0x1abe   :  { %v1064_v37 = vsel %vm1063_vm0, %v1062_v6, %v1045_v7  ;;  %vm1065_vm1 = vcmp.eq.s32.totalorder %v1678_v10, %v1062_v6 }
0x1abf   :  { %v1066_v44 = vsel %vm1065_vm1, %v825_v57, 0 }
0x1ac0   :  { %v1067_v8 = vsel %vm661_vm2, %v1066_v44, 2147483648 }
0x1ac1   :  { %v1068_v26 = vrot.slane %v1067_v8, 4 }
0x1ac3   :  { %vm1069_vm5 = vcmp.gt.s32.totalorder %v1067_v8, %v1068_v26 }
0x1ac4   :  { %v1070_v28 = vsel %vm1069_vm5, %v1067_v8, %v1068_v26 }
0x1ac5   :  { %v1071_v63 = vrot.slane %v1070_v28, 2 }
0x1ac7   :  { %vm1072_vm3 = vcmp.gt.s32.totalorder %v1070_v28, %v1071_v63 }
0x1ac8   :  { %v1073_v46 = vsel %vm1072_vm3, %v1070_v28, %v1071_v63 }
0x1ac9   :  { %v1074_v49 = vrot.slane %v1073_v46, 1 }
0x1acb   :  { %vm1075_vm9 = vcmp.gt.s32.totalorder %v1073_v46, %v1074_v49 }
0x1acc   :  { %v1076_v13 = vsel %vm1075_vm9, %v1073_v46, %v1074_v49 }
0x1acd   :  { %vm1079_vm7 = vcmp.eq.s32.totalorder %v1582_v12, %v1076_v13  ;;  %v1078_v10 = vsel %vm1077_vm6, %v1076_v13, %v1064_v37 }
0x1ace   :  { %v1080_v16 = vsel %vm1079_vm7, %v802_v15, 0 }
0x1acf   :  { %v1081_v17 = vsel %vm734_vm10, %v1080_v16, 2147483648  ;;  %vm1096_vm10 = vcmp.eq.s32.totalorder %v1582_v12, 0 }
0x1ad0   :  { %v1083_v18 = vshra.s32 %v1081_v17, 16  ;;  %v1082_v20 = vand.u32 65535, %v1081_v17 }
0x1ad2   :  { %v1085_v19 = vcvt.s32.f32 %v1083_v18  ;;  %v1084_v22 = vcvt.s32.f32 %v1082_v20 }
0x1ad4   :  { %1086 = vmax.xlane.f32.xlu0 %v1085_v19 }
0x1b47   :  { %v1087_v21 = vpop.xlane.xlu0 %1086 }
0x1b48   :  { %vm1088_vm2 = vcmp.eq.f32.partialorder %v1085_v19, %v1087_v21  ;;  %v1093_v1 = vcvt.f32.s32 %v1087_v21 }
0x1b49   :  { %v1089_v23 = vsel %vm1088_vm2, %v1084_v22, -inf }
0x1b4a   :  { %1090 = vmax.xlane.f32.xlu2 %v1089_v23  ;;  %v1094_v52 = vshll.u32 %v1093_v1, 16 }
0x1bbd   :  { %v1091_v4 = vpop.xlane.xlu2 %1090 }
0x1bbe   :  { %v1092_v61 = vcvt.f32.s32 %v1091_v4 }
0x1bc0   :  { %v1095_v24 = vadd.s32 %v1094_v52, %v1092_v61 }
0x1bc2   :  { %v1097_v25 = vsel %vm1096_vm10, %v1095_v24, %v1078_v10 }
0x1bc3   :  { %1099 = vst.msk [vmem:[#allocation8 - $0x7] sm:$0x80] %vm1098_vm11, %v1097_v25 }
0x1bc4   :  { %1132 = dma.vmem_to_hbm [thread:$0]  %s1128_s17, 16, %s1130_s12, [#allocation7]  }
0x1bc5   :  { %1350 = dma.done.wait [#allocation4], 128  }
0x1bc6   :  { %1351 = vsyncadd [#allocation4], 4294967168 }
0x1bc7   :  { %1352 = dma.done.wait [#allocation7], 32  }
0x1bc8   :  { %1353 = vsyncadd [#allocation7], 4294967264 }
0x1bc9   :  { %1145 = vsyncpa [#allocation3], 1 }
0x1bca   :  { %1146 = vsyncpa [#allocation4], 1 }
0x1bcb   :  { %1147 = vsyncpa [#allocation7], 1 }

</bundles_post_ra>
